<compile_context>
chip_gen: v6e
topology: v6e:2x2x1
jax: 0.10.0
libtpu: 0.0.40
codegen_flags: <defaults>
</compile_context>

<pallas_src>
import jax
import jax.numpy as jnp
from jax.experimental import pallas as pl
from jax.experimental.pallas import tpu as pltpu

IN_DIM = 1 * 28 * 28      # 784
HID = 300                 # logical hidden width
OUT = 10                  # logical number of classes
HID_P = 384               # hidden padded to a multiple of 128 lanes
OUT_P = 128               # logits padded to one full lane group


def mlp_kernel(x_ref,
               w1_ref, b1_ref,
               w2_ref, b2_ref,
               w3_ref, b3_ref,
               w4_ref, b4_ref,
               w5_ref, b5_ref,
               o_ref):
    """Fused forward pass: 4x (Linear + ReLU) + final Linear, all on-chip.

    All matmuls are bf16 x bf16 on the MXU with f32 accumulation; biases are
    added in f32. Dropout is identity (eval mode).
    """
    h = x_ref[...].astype(jnp.bfloat16)

    h = jnp.dot(h, w1_ref[...], preferred_element_type=jnp.float32) + b1_ref[...]
    h = jnp.maximum(h, 0.0).astype(jnp.bfloat16)      # ReLU (dropout1 = identity)

    h = jnp.dot(h, w2_ref[...], preferred_element_type=jnp.float32) + b2_ref[...]
    h = jnp.maximum(h, 0.0).astype(jnp.bfloat16)      # ReLU (dropout2 = identity)

    h = jnp.dot(h, w3_ref[...], preferred_element_type=jnp.float32) + b3_ref[...]
    h = jnp.maximum(h, 0.0).astype(jnp.bfloat16)      # ReLU (dropout3 = identity)

    h = jnp.dot(h, w4_ref[...], preferred_element_type=jnp.float32) + b4_ref[...]
    h = jnp.maximum(h, 0.0).astype(jnp.bfloat16)      # ReLU (dropout4 = identity)

    out = jnp.dot(h, w5_ref[...], preferred_element_type=jnp.float32) + b5_ref[...]
    o_ref[...] = out.astype(o_ref.dtype)              # (tm, 128) lane-dense store


def model_d_forward(x_nchw, params):
    """x_nchw: (B, 1, 28, 28) float32. Returns logits (B, 10) float32."""
    B = x_nchw.shape[0]
    x2d = x_nchw.reshape(B, -1)       # same as torch x.view(B, -1)

    (w1, b1, w2, b2, w3, b3, w4, b4, w5, b5) = params

    # Batch tile: 256 rows on v6e/v7x-sized MXUs; small batches use one tile.
    tm = B if B <= 256 else 256
    grid = (pl.cdiv(B, tm),)

    x_spec = pl.BlockSpec((tm, IN_DIM), lambda i: (i, 0))
    out_spec = pl.BlockSpec((tm, OUT_P), lambda i: (i, 0))

    def resident(arr):
        # Full-array block with a constant block index: DMA'd once, pinned in
        # VMEM across all batch tiles.
        return pl.BlockSpec(arr.shape, lambda i: (0, 0))

    param_specs = [resident(p) for p in
                   (w1, b1, w2, b2, w3, b3, w4, b4, w5, b5)]

    flops = 2 * B * (IN_DIM * HID_P + 3 * HID_P * HID_P + HID_P * OUT_P)
    bytes_accessed = (x2d.size * x2d.dtype.itemsize
                      + sum(int(p.size) * p.dtype.itemsize for p in params)
                      + B * OUT_P * 4)

    out_padded = pl.pallas_call(
        mlp_kernel,
        out_shape=jax.ShapeDtypeStruct((B, OUT_P), jnp.float32),
        grid=grid,
        in_specs=[x_spec] + param_specs,
        out_specs=out_spec,
        compiler_params=pltpu.CompilerParams(
            dimension_semantics=("parallel",),     # shard batch across TCs (v7x)
            vmem_limit_bytes=32 << 20,             # right-sized (fits v7x 64 MiB)
        ),
        cost_estimate=pl.CostEstimate(
            flops=flops, transcendentals=0, bytes_accessed=bytes_accessed),
    )(x2d, w1, b1, w2, b2, w3, b3, w4, b4, w5, b5)

    return out_padded[:, :OUT]


def init_params(key):
    """PyTorch nn.Linear-style init (U(-1/sqrt(fan_in), 1/sqrt(fan_in))) on the
    logical shapes, then zero-padded to lane-multiple shapes. Weights are cast
    to bf16 (stored transposed: (in_features, out_features)); biases stay f32
    as (1, out_padded) rows."""
    dims = [(IN_DIM, HID), (HID, HID), (HID, HID), (HID, HID), (HID, OUT)]
    padded = [(IN_DIM, HID_P), (HID_P, HID_P), (HID_P, HID_P), (HID_P, HID_P),
              (HID_P, OUT_P)]
    params = []
    for (fi, fo), (pi, po) in zip(dims, padded):
        key, kw, kb = jax.random.split(key, 3)
        bound = 1.0 / jnp.sqrt(jnp.float32(fi))
        w = jax.random.uniform(kw, (fi, fo), jnp.float32, -bound, bound)
        b = jax.random.uniform(kb, (fo,), jnp.float32, -bound, bound)
        w_p = jnp.zeros((pi, po), jnp.float32).at[:fi, :fo].set(w)
        b_p = jnp.zeros((1, po), jnp.float32).at[0, :fo].set(b)
        params += [w_p.astype(jnp.bfloat16), b_p]
    return tuple(params)


def reference_forward(x_nchw, params):
    """Pure-JAX reference mirroring the kernel's bf16-weight / f32-accumulate
    arithmetic (dropout = identity, eval mode)."""
    (w1, b1, w2, b2, w3, b3, w4, b4, w5, b5) = params
    h = x_nchw.reshape(x_nchw.shape[0], -1).astype(jnp.bfloat16)
    for w, b in ((w1, b1), (w2, b2), (w3, b3), (w4, b4)):
        h = jnp.dot(h, w, preferred_element_type=jnp.float32) + b
        h = jnp.maximum(h, 0.0).astype(jnp.bfloat16)
    out = jnp.dot(h, w5, preferred_element_type=jnp.float32) + b5
    return out[:, :OUT]


if __name__ == "__main__":
    key = jax.random.PRNGKey(0)
    key, kx = jax.random.split(key)

    B = 8
    x = jax.random.normal(kx, (B, 1, 28, 28), jnp.float32)   # MNIST-shaped input
    params = init_params(key)

    out = model_d_forward(x, params)
    out = jax.block_until_ready(out)

    ref = reference_forward(x, params)
    assert out.shape == (B, 10), out.shape
    assert jnp.allclose(out, ref, atol=1e-2, rtol=1e-2), "mismatch vs reference"

    print("KERNEL_OK")
</pallas_src>

<mosaic_0001>
module attributes {stable_mosaic.version = 11 : i64} {
  func.func @mlp_kernel(%arg0: i32, %arg1: memref<8x784xf32, #tpu.memory_space<vmem>>, %arg2: memref<784x384xbf16, #tpu.memory_space<vmem>>, %arg3: memref<1x384xf32, #tpu.memory_space<vmem>>, %arg4: memref<384x384xbf16, #tpu.memory_space<vmem>>, %arg5: memref<1x384xf32, #tpu.memory_space<vmem>>, %arg6: memref<384x384xbf16, #tpu.memory_space<vmem>>, %arg7: memref<1x384xf32, #tpu.memory_space<vmem>>, %arg8: memref<384x384xbf16, #tpu.memory_space<vmem>>, %arg9: memref<1x384xf32, #tpu.memory_space<vmem>>, %arg10: memref<384x128xbf16, #tpu.memory_space<vmem>>, %arg11: memref<1x128xf32, #tpu.memory_space<vmem>>, %arg12: memref<8x128xf32, #tpu.memory_space<vmem>>) attributes {dimension_semantics = [#tpu.dimension_semantics<parallel>], iteration_bounds = array<i64: 1>, scalar_prefetch = 0 : i64, scratch_operands = 0 : i64, tpu.core_type = #tpu.core_type<tc>, window_params = [{transform_indices = @transform_0, window_bounds = array<i64: 8, 784>}, {pipeline_mode = #tpu.pipeline_mode<synchronous>, transform_indices = @transform_1, window_bounds = array<i64: 784, 384>}, {pipeline_mode = #tpu.pipeline_mode<synchronous>, transform_indices = @transform_2, window_bounds = array<i64: 1, 384>}, {pipeline_mode = #tpu.pipeline_mode<synchronous>, transform_indices = @transform_3, window_bounds = array<i64: 384, 384>}, {pipeline_mode = #tpu.pipeline_mode<synchronous>, transform_indices = @transform_4, window_bounds = array<i64: 1, 384>}, {pipeline_mode = #tpu.pipeline_mode<synchronous>, transform_indices = @transform_5, window_bounds = array<i64: 384, 384>}, {pipeline_mode = #tpu.pipeline_mode<synchronous>, transform_indices = @transform_6, window_bounds = array<i64: 1, 384>}, {pipeline_mode = #tpu.pipeline_mode<synchronous>, transform_indices = @transform_7, window_bounds = array<i64: 384, 384>}, {pipeline_mode = #tpu.pipeline_mode<synchronous>, transform_indices = @transform_8, window_bounds = array<i64: 1, 384>}, {pipeline_mode = #tpu.pipeline_mode<synchronous>, transform_indices = @transform_9, window_bounds = array<i64: 384, 128>}, {pipeline_mode = #tpu.pipeline_mode<synchronous>, transform_indices = @transform_10, window_bounds = array<i64: 1, 128>}, {transform_indices = @transform_11, window_bounds = array<i64: 8, 128>}]} {
    %c0 = arith.constant 0 : index
    %c0_0 = arith.constant 0 : index
    %0 = vector.load %arg1[%c0, %c0_0] : memref<8x784xf32, #tpu.memory_space<vmem>>, vector<8x784xf32>
    %1 = arith.truncf %0 : vector<8x784xf32> to vector<8x784xbf16>
    %c0_1 = arith.constant 0 : index
    %c0_2 = arith.constant 0 : index
    %2 = vector.load %arg2[%c0_1, %c0_2] : memref<784x384xbf16, #tpu.memory_space<vmem>>, vector<784x384xbf16>
    %cst = arith.constant dense<0.000000e+00> : vector<8x384xf32>
    %3 = tpu.matmul %1, %2, %cst {dimension_numbers = #tpu.dot_dimension_numbers<[1], [0], [0], [1], [0, 0, 1, 1], [], []>} : vector<8x784xbf16>, vector<784x384xbf16>, vector<8x384xf32> -> vector<8x384xf32>
    %c0_3 = arith.constant 0 : index
    %c0_4 = arith.constant 0 : index
    %4 = vector.load %arg3[%c0_3, %c0_4] : memref<1x384xf32, #tpu.memory_space<vmem>>, vector<1x384xf32>
    %5 = vector.broadcast %4 : vector<1x384xf32> to vector<8x384xf32>
    %6 = arith.addf %3, %5 : vector<8x384xf32>
    %cst_5 = arith.constant 0.000000e+00 : f32
    %7 = vector.broadcast %cst_5 : f32 to vector<8x384xf32>
    %8 = arith.maximumf %6, %7 : vector<8x384xf32>
    %9 = arith.truncf %8 : vector<8x384xf32> to vector<8x384xbf16>
    %c0_6 = arith.constant 0 : index
    %c0_7 = arith.constant 0 : index
    %10 = vector.load %arg4[%c0_6, %c0_7] : memref<384x384xbf16, #tpu.memory_space<vmem>>, vector<384x384xbf16>
    %cst_8 = arith.constant dense<0.000000e+00> : vector<8x384xf32>
    %11 = tpu.matmul %9, %10, %cst_8 {dimension_numbers = #tpu.dot_dimension_numbers<[1], [0], [0], [1], [0, 0, 1, 1], [], []>} : vector<8x384xbf16>, vector<384x384xbf16>, vector<8x384xf32> -> vector<8x384xf32>
    %c0_9 = arith.constant 0 : index
    %c0_10 = arith.constant 0 : index
    %12 = vector.load %arg5[%c0_9, %c0_10] : memref<1x384xf32, #tpu.memory_space<vmem>>, vector<1x384xf32>
    %13 = vector.broadcast %12 : vector<1x384xf32> to vector<8x384xf32>
    %14 = arith.addf %11, %13 : vector<8x384xf32>
    %cst_11 = arith.constant 0.000000e+00 : f32
    %15 = vector.broadcast %cst_11 : f32 to vector<8x384xf32>
    %16 = arith.maximumf %14, %15 : vector<8x384xf32>
    %17 = arith.truncf %16 : vector<8x384xf32> to vector<8x384xbf16>
    %c0_12 = arith.constant 0 : index
    %c0_13 = arith.constant 0 : index
    %18 = vector.load %arg6[%c0_12, %c0_13] : memref<384x384xbf16, #tpu.memory_space<vmem>>, vector<384x384xbf16>
    %cst_14 = arith.constant dense<0.000000e+00> : vector<8x384xf32>
    %19 = tpu.matmul %17, %18, %cst_14 {dimension_numbers = #tpu.dot_dimension_numbers<[1], [0], [0], [1], [0, 0, 1, 1], [], []>} : vector<8x384xbf16>, vector<384x384xbf16>, vector<8x384xf32> -> vector<8x384xf32>
    %c0_15 = arith.constant 0 : index
    %c0_16 = arith.constant 0 : index
    %20 = vector.load %arg7[%c0_15, %c0_16] : memref<1x384xf32, #tpu.memory_space<vmem>>, vector<1x384xf32>
    %21 = vector.broadcast %20 : vector<1x384xf32> to vector<8x384xf32>
    %22 = arith.addf %19, %21 : vector<8x384xf32>
    %cst_17 = arith.constant 0.000000e+00 : f32
    %23 = vector.broadcast %cst_17 : f32 to vector<8x384xf32>
    %24 = arith.maximumf %22, %23 : vector<8x384xf32>
    %25 = arith.truncf %24 : vector<8x384xf32> to vector<8x384xbf16>
    %c0_18 = arith.constant 0 : index
    %c0_19 = arith.constant 0 : index
    %26 = vector.load %arg8[%c0_18, %c0_19] : memref<384x384xbf16, #tpu.memory_space<vmem>>, vector<384x384xbf16>
    %cst_20 = arith.constant dense<0.000000e+00> : vector<8x384xf32>
    %27 = tpu.matmul %25, %26, %cst_20 {dimension_numbers = #tpu.dot_dimension_numbers<[1], [0], [0], [1], [0, 0, 1, 1], [], []>} : vector<8x384xbf16>, vector<384x384xbf16>, vector<8x384xf32> -> vector<8x384xf32>
    %c0_21 = arith.constant 0 : index
    %c0_22 = arith.constant 0 : index
    %28 = vector.load %arg9[%c0_21, %c0_22] : memref<1x384xf32, #tpu.memory_space<vmem>>, vector<1x384xf32>
    %29 = vector.broadcast %28 : vector<1x384xf32> to vector<8x384xf32>
    %30 = arith.addf %27, %29 : vector<8x384xf32>
    %cst_23 = arith.constant 0.000000e+00 : f32
    %31 = vector.broadcast %cst_23 : f32 to vector<8x384xf32>
    %32 = arith.maximumf %30, %31 : vector<8x384xf32>
    %33 = arith.truncf %32 : vector<8x384xf32> to vector<8x384xbf16>
    %c0_24 = arith.constant 0 : index
    %c0_25 = arith.constant 0 : index
    %34 = vector.load %arg10[%c0_24, %c0_25] : memref<384x128xbf16, #tpu.memory_space<vmem>>, vector<384x128xbf16>
    %cst_26 = arith.constant dense<0.000000e+00> : vector<8x128xf32>
    %35 = tpu.matmul %33, %34, %cst_26 {dimension_numbers = #tpu.dot_dimension_numbers<[1], [0], [0], [1], [0, 0, 1, 1], [], []>} : vector<8x384xbf16>, vector<384x128xbf16>, vector<8x128xf32> -> vector<8x128xf32>
    %c0_27 = arith.constant 0 : index
    %c0_28 = arith.constant 0 : index
    %36 = vector.load %arg11[%c0_27, %c0_28] : memref<1x128xf32, #tpu.memory_space<vmem>>, vector<1x128xf32>
    %37 = vector.broadcast %36 : vector<1x128xf32> to vector<8x128xf32>
    %38 = arith.addf %35, %37 : vector<8x128xf32>
    %c0_29 = arith.constant 0 : index
    %c0_30 = arith.constant 0 : index
    %39 = vector.load %arg12[%c0_29, %c0_30] : memref<8x128xf32, #tpu.memory_space<vmem>>, vector<8x128xf32>
    tpu.vector_store %arg12[%c0_29, %c0_30], %38 {strides = array<i32>} : memref<8x128xf32, #tpu.memory_space<vmem>>, vector<8x128xf32>,
    return
  }
  func.func @transform_0(%arg0: i32) -> (i32, i32) {
    %c0_i32 = arith.constant 0 : i32
    %c0_i32_0 = arith.constant 0 : i32
    return %arg0, %c0_i32 : i32, i32
  }
  func.func @transform_1(%arg0: i32) -> (i32, i32) {
    %c0_i32 = arith.constant 0 : i32
    %c0_i32_0 = arith.constant 0 : i32
    %c0_i32_1 = arith.constant 0 : i32
    return %c0_i32, %c0_i32_0 : i32, i32
  }
  func.func @transform_2(%arg0: i32) -> (i32, i32) {
    %c0_i32 = arith.constant 0 : i32
    %c0_i32_0 = arith.constant 0 : i32
    %c0_i32_1 = arith.constant 0 : i32
    return %c0_i32, %c0_i32_0 : i32, i32
  }
  func.func @transform_3(%arg0: i32) -> (i32, i32) {
    %c0_i32 = arith.constant 0 : i32
    %c0_i32_0 = arith.constant 0 : i32
    %c0_i32_1 = arith.constant 0 : i32
    return %c0_i32, %c0_i32_0 : i32, i32
  }
  func.func @transform_4(%arg0: i32) -> (i32, i32) {
    %c0_i32 = arith.constant 0 : i32
    %c0_i32_0 = arith.constant 0 : i32
    %c0_i32_1 = arith.constant 0 : i32
    return %c0_i32, %c0_i32_0 : i32, i32
  }
  func.func @transform_5(%arg0: i32) -> (i32, i32) {
    %c0_i32 = arith.constant 0 : i32
    %c0_i32_0 = arith.constant 0 : i32
    %c0_i32_1 = arith.constant 0 : i32
    return %c0_i32, %c0_i32_0 : i32, i32
  }
  func.func @transform_6(%arg0: i32) -> (i32, i32) {
    %c0_i32 = arith.constant 0 : i32
    %c0_i32_0 = arith.constant 0 : i32
    %c0_i32_1 = arith.constant 0 : i32
    return %c0_i32, %c0_i32_0 : i32, i32
  }
  func.func @transform_7(%arg0: i32) -> (i32, i32) {
    %c0_i32 = arith.constant 0 : i32
    %c0_i32_0 = arith.constant 0 : i32
    %c0_i32_1 = arith.constant 0 : i32
    return %c0_i32, %c0_i32_0 : i32, i32
  }
  func.func @transform_8(%arg0: i32) -> (i32, i32) {
    %c0_i32 = arith.constant 0 : i32
    %c0_i32_0 = arith.constant 0 : i32
    %c0_i32_1 = arith.constant 0 : i32
    return %c0_i32, %c0_i32_0 : i32, i32
  }
  func.func @transform_9(%arg0: i32) -> (i32, i32) {
    %c0_i32 = arith.constant 0 : i32
    %c0_i32_0 = arith.constant 0 : i32
    %c0_i32_1 = arith.constant 0 : i32
    return %c0_i32, %c0_i32_0 : i32, i32
  }
  func.func @transform_10(%arg0: i32) -> (i32, i32) {
    %c0_i32 = arith.constant 0 : i32
    %c0_i32_0 = arith.constant 0 : i32
    %c0_i32_1 = arith.constant 0 : i32
    return %c0_i32, %c0_i32_0 : i32, i32
  }
  func.func @transform_11(%arg0: i32) -> (i32, i32) {
    %c0_i32 = arith.constant 0 : i32
    %c0_i32_0 = arith.constant 0 : i32
    return %arg0, %c0_i32 : i32, i32
  }
}

</mosaic_0001>

<bundles_post_ra>
// kernel: tpu_custom_call.1
= control target key start
LH: loop header
LB: loop body
LE: loop exit
PB: predicated region body
PF: predicated region fallthrough
CT: control target
= control target key end

     0   :  { %16 = vsyncpa [#allocation3], 0  ;;  %s5322_s0 = inlined_call_operand.hbm [shape: f32[8,784], index: 0, kind: input, shape index: {}]   ;;  %s5323_s1 = inlined_call_operand.hbm [shape: bf16[784,384], index: 1, kind: input, shape index: {}]   ;;  %s5324_s2 = inlined_call_operand.vmem [shape: f32[1,384], index: 2, kind: input, shape index: {}]   ;;  %s5325_s3 = inlined_call_operand.hbm [shape: bf16[384,384], index: 3, kind: input, shape index: {}]   ;;  %s5326_s4 = inlined_call_operand.vmem [shape: f32[1,384], index: 4, kind: input, shape index: {}]   ;;  %s5327_s5 = inlined_call_operand.hbm [shape: bf16[384,384], index: 5, kind: input, shape index: {}]   ;;  %s5328_s6 = inlined_call_operand.vmem [shape: f32[1,384], index: 6, kind: input, shape index: {}]   ;;  %s5329_s7 = inlined_call_operand.hbm [shape: bf16[384,384], index: 7, kind: input, shape index: {}]   ;;  %s5330_s8 = inlined_call_operand.vmem [shape: f32[1,384], index: 8, kind: input, shape index: {}]   ;;  %s5331_s9 = inlined_call_operand.hbm [shape: bf16[384,128], index: 9, kind: input, shape index: {}]   ;;  %s5332_s10 = inlined_call_operand.vmem [shape: f32[1,128], index: 10, kind: input, shape index: {}]   ;;  %s5333_s11 = inlined_call_operand.hbm [shape: f32[8,128], index: 11, kind: output, shape index: {}]  }
   0x1   :  { %17 = vsyncpa [#allocation6], 0 }
   0x2   :  { %18 = vsyncpa [#allocation9], 0 }
   0x3   :  { %19 = vsyncpa [#allocation12], 0 }
   0x4   :  { %20 = vsyncpa [#allocation4], 0  ;;  %s5098_s17 = smov [#allocation5]  }
   0x5   :  { %s36_s18 = sshll.u32 %s5098_s17, 4  ;;  %s37_s18 = int_to_ptr.vmem [resolvable:$true] %s36_s18 }
   0x6   :  { %s4956_s19 = scalar_lea.vmem %s37_s18, 18816  ;;  %p4961_p1 = scmp.lt.s32.totalorder %s37_s18, %s37_s18 }
   0x7   :  { %p4957_p0 = scmp.ne.s32.totalorder %s37_s18, %s4956_s19  ;;  %p4962_p2 = scmp.lt.s32.totalorder %s4956_s19, %s4956_s19 }
   0x9   :  { %p4963_p3 = por %p4962_p2, %p4961_p1 }
   0xb   :  { %p4964_p4 = pnand %p4963_p3, %p4957_p0 }
   0xd   :  { %4967 = shalt.err (!%p4964_p4)
}
   0xe   :  { %s5099_s20 = smov 192   ;;  %s5100_s21 = smov 12  }
   0xf   :  { %42 = dma.hbm_to_vmem [thread:$0]  %s5323_s1, 18816, %s37_s18, [#allocation6], %s5099_s20, %s5099_s20, %s5100_s21  }
  0x10   :  { %s5101_s24 = smov [#allocation8]   ;;  %s5102_s26 = smov [#allocation2]  }
  0x11   :  { %s64_s25 = sshll.u32 %s5101_s24, 4  ;;  %s27_s27 = sshll.u32 %s5102_s26, 4  ;;  %s65_s25 = int_to_ptr.vmem [resolvable:$true] %s64_s25  ;;  %s28_s27 = int_to_ptr.vmem [resolvable:$true] %s27_s27 }
  0x12   :  { %s4976_s28 = scalar_lea.vmem %s65_s25, 9216  ;;  %p4981_p6 = scmp.lt.s32.totalorder %s65_s25, %s65_s25 }
  0x13   :  { %p4977_p5 = scmp.ne.s32.totalorder %s65_s25, %s4976_s28  ;;  %p4982_p7 = scmp.lt.s32.totalorder %s4976_s28, %s4976_s28 }
  0x15   :  { %p4983_p8 = por %p4982_p7, %p4981_p6 }
  0x17   :  { %p4984_p9 = pnand %p4983_p8, %p4977_p5 }
  0x19   :  { %4987 = shalt.err (!%p4984_p9)
}
  0x1a   :  { %70 = dma.hbm_to_vmem [thread:$0]  %s5327_s5, 9216, %s65_s25, [#allocation9], %s5099_s20, %s5099_s20, %s5100_s21  }
  0x1b   :  { %s4996_s1 = scalar_lea.vmem %s28_s27, 896  ;;  %p5001_p11 = scmp.lt.s32.totalorder %s28_s27, %s28_s27 }
  0x1c   :  { %p4997_p10 = scmp.ne.s32.totalorder %s28_s27, %s4996_s1  ;;  %p5002_p12 = scmp.lt.s32.totalorder %s4996_s1, %s4996_s1 }
  0x1e   :  { %p5003_p13 = por %p5002_p12, %p5001_p11 }
  0x20   :  { %p5004_p0 = pnand %p5003_p13, %p4997_p10 }
  0x22   :  { %5007 = shalt.err (!%p5004_p0)
}
  0x23   :  { %30 = dma.hbm_to_vmem [thread:$0]  %s5322_s0, 896, %s28_s27, [#allocation3]  }
  0x24   :  { %s5103_s14 = smov [#allocation7]   ;;  %s5104_s16 = smov [#allocation10]  }
  0x25   :  { %s50_s15 = sshll.u32 %s5103_s14, 4  ;;  %s78_s17 = sshll.u32 %s5104_s16, 4  ;;  %s51_s15 = int_to_ptr.vmem [resolvable:$true] %s50_s15  ;;  %s79_s17 = int_to_ptr.vmem [resolvable:$true] %s78_s17 }
  0x26   :  { %s5016_s18 = scalar_lea.vmem %s51_s15, 9216  ;;  %p5021_p2 = scmp.lt.s32.totalorder %s51_s15, %s51_s15 }
  0x27   :  { %p5017_p1 = scmp.ne.s32.totalorder %s51_s15, %s5016_s18  ;;  %p5022_p3 = scmp.lt.s32.totalorder %s5016_s18, %s5016_s18 }
  0x29   :  { %p5023_p4 = por %p5022_p3, %p5021_p2 }
  0x2b   :  { %p5024_p5 = pnand %p5023_p4, %p5017_p1 }
  0x2d   :  { %5027 = shalt.err (!%p5024_p5)
}
  0x2e   :  { %56 = dma.hbm_to_vmem [thread:$0]  %s5325_s3, 9216, %s51_s15, [#allocation6], %s5099_s20, %s5099_s20, %s5100_s21  }
  0x2f   :  { %s5036_s0 = scalar_lea.vmem %s79_s17, 9216  ;;  %p5041_p7 = scmp.lt.s32.totalorder %s79_s17, %s79_s17 }
  0x30   :  { %p5037_p6 = scmp.ne.s32.totalorder %s79_s17, %s5036_s0  ;;  %p5042_p8 = scmp.lt.s32.totalorder %s5036_s0, %s5036_s0 }
  0x32   :  { %p5043_p9 = por %p5042_p8, %p5041_p7 }
  0x34   :  { %p5044_p10 = pnand %p5043_p9, %p5037_p6 }
  0x36   :  { %5047 = shalt.err (!%p5044_p10)
}
  0x37   :  { %84 = dma.hbm_to_vmem [thread:$0]  %s5329_s7, 9216, %s79_s17, [#allocation9], %s5099_s20, %s5099_s20, %s5100_s21  }
  0x38   :  { %s5105_s24 = smov [#allocation11]  }
  0x39   :  { %s92_s25 = sshll.u32 %s5105_s24, 4  ;;  %s93_s25 = int_to_ptr.vmem [resolvable:$true] %s92_s25 }
  0x3a   :  { %s5056_s26 = scalar_lea.vmem %s93_s25, 3072  ;;  %p5061_p12 = scmp.lt.s32.totalorder %s93_s25, %s93_s25 }
  0x3b   :  { %p5057_p11 = scmp.ne.s32.totalorder %s93_s25, %s5056_s26  ;;  %p5062_p13 = scmp.lt.s32.totalorder %s5056_s26, %s5056_s26 }
  0x3d   :  { %p5063_p0 = por %p5062_p13, %p5061_p12 }
  0x3f   :  { %p5064_p1 = pnand %p5063_p0, %p5057_p11 }
  0x41   :  { %5067 = shalt.err (!%p5064_p1)
}
  0x42   :  { %s5106_s3 = smov 64   ;;  %s5107_s27 = smov 4  }
  0x43   :  { %98 = dma.hbm_to_vmem [thread:$0]  %s5331_s9, 3072, %s93_s25, [#allocation12], %s5106_s3, %s5106_s3, %s5107_s27  }
  0x44   :  { %5088 = dma.done.wait [#allocation3], 896  }
  0x45   :  { %5089 = vsyncadd [#allocation3], 4294966400 }
  0x46   :  { %5090 = dma.done.wait [#allocation6], 28032  }
  0x47   :  { %5091 = vsyncadd [#allocation6], 4294939264 }
  0x48   :  { %5092 = dma.done.wait [#allocation9], 18432  }
  0x49   :  { %5093 = vsyncadd [#allocation9], 4294948864 }
  0x4a   :  { %5094 = dma.done.wait [#allocation12], 3072  }
  0x4b   :  { %5095 = vsyncadd [#allocation12], 4294964224  ;;  %v4440_v0 = vld [vmem:[#allocation5 + $0xac] ss:$12 sps:$4 sm:$0xff]   ;;  %v4442_v1 = vld [vmem:[#allocation5 + $0xa8] ss:$12 sps:$4 sm:$0xff]  }
  0x4c   :  { %1135 = vmatprep.subr.bf16.mxu0 %v4440_v0  ;;  %v4443_v2 = vld [vmem:[#allocation5 + $0x22c] ss:$12 sps:$4 sm:$0xff]   ;;  %v4445_v3 = vld [vmem:[#allocation5 + $0x228] ss:$12 sps:$4 sm:$0xff]   ;;  %v4448_v5 = vld [vmem:[#allocation5 + $0x90] ss:$12 sps:$4 sm:$0xff]  }
  0x4d   :  { %1136 = vmatpush1.bf16.msra.mxu0 %v4442_v1  ;;  %v4446_v4 = vld [vmem:[#allocation5 + $0x94] ss:$12 sps:$4 sm:$0xff]   ;;  %1176 = vmatprep.subr.bf16.mxu1 %v4443_v2  ;;  %v4451_v7 = vld [vmem:[#allocation5 + $0x210] ss:$12 sps:$4 sm:$0xff]   ;;  %v4454_v9 = vld [vmem:[#allocation5 + $0x78] ss:$12 sps:$4 sm:$0xff]  }
  0x4e   :  { %v4449_v6 = vld [vmem:[#allocation5 + $0x214] ss:$12 sps:$4 sm:$0xff]   ;;  %1177 = vmatpush1.bf16.msra.mxu1 %v4445_v3  ;;  %1137 = vmatprep.subr.bf16.mxu0 %v4446_v4  ;;  %v4452_v8 = vld [vmem:[#allocation5 + $0x7c] ss:$12 sps:$4 sm:$0xff]   ;;  %v4458_v11 = vld [vmem:[#allocation5 + $0x64] ss:$12 sps:$4 sm:$0xff]  }
  0x4f   :  { %1178 = vmatprep.subr.bf16.mxu1 %v4449_v6  ;;  %v4455_v10 = vld [vmem:[#allocation5 + $0x1fc] ss:$12 sps:$4 sm:$0xff]   ;;  %v4457_v12 = vld [vmem:[#allocation5 + $0x1f8] ss:$12 sps:$4 sm:$0xff]   ;;  %v4460_v14 = vld [vmem:[#allocation5 + $0x60] ss:$12 sps:$4 sm:$0xff]  }
  0x50   :  { %v4461_v13 = vld [vmem:[#allocation5 + $0x1e4] ss:$12 sps:$4 sm:$0xff]   ;;  %v4464_v15 = vld [vmem:[#allocation5 + $0x4c] ss:$12 sps:$4 sm:$0xff]   ;;  %v4466_v18 = vld [vmem:[#allocation5 + $0x48] ss:$12 sps:$4 sm:$0xff]  }
  0x51   :  { %1138 = vmatpush1.bf16.msra.mxu0 %v4448_v5  ;;  %v4463_v16 = vld [vmem:[#allocation5 + $0x1e0] ss:$12 sps:$4 sm:$0xff]   ;;  %v4469_v20 = vld [vmem:[#allocation5 + $0x1c8] ss:$12 sps:$4 sm:$0xff]   ;;  %v4472_v22 = vld [vmem:[#allocation5 + $0x30] ss:$12 sps:$4 sm:$0xff]  }
  0x52   :  { %1139 = vmatprep.subr.bf16.mxu0 %v4452_v8  ;;  %1179 = vmatpush1.bf16.msra.mxu1 %v4451_v7  ;;  %v4467_v17 = vld [vmem:[#allocation5 + $0x1cc] ss:$12 sps:$4 sm:$0xff]   ;;  %v4470_v19 = vld [vmem:[#allocation5 + $0x34] ss:$12 sps:$4 sm:$0xff]   ;;  %v4476_v23 = vld [vmem:[#allocation5 + $0x1c] ss:$12 sps:$4 sm:$0xff]  }
  0x53   :  { %1180 = vmatprep.subr.bf16.mxu1 %v4455_v10  ;;  %v4473_v21 = vld [vmem:[#allocation5 + $0x1b4] ss:$12 sps:$4 sm:$0xff]   ;;  %v4475_v24 = vld [vmem:[#allocation5 + $0x1b0] ss:$12 sps:$4 sm:$0xff]   ;;  %v4478_v26 = vld [vmem:[#allocation5 + $0x18] ss:$12 sps:$4 sm:$0xff]  }
  0x54   :  { %v4479_v25 = vld [vmem:[#allocation5 + $0x19c] ss:$12 sps:$4 sm:$0xff]   ;;  %v4482_v27 = vld [vmem:[#allocation5 + $0x4] ss:$12 sps:$4 sm:$0xff]   ;;  %v4484_v30 = vld [vmem:[#allocation5] ss:$12 sps:$4 sm:$0xff]  }
  0x55   :  { %1140 = vmatpush1.bf16.msra.mxu0 %v4454_v9  ;;  %v4481_v28 = vld [vmem:[#allocation5 + $0x198] ss:$12 sps:$4 sm:$0xff]   ;;  %v4487_v32 = vld [vmem:[#allocation5 + $0x180] ss:$12 sps:$4 sm:$0xff]   ;;  %v4490_v34 = vld [vmem:[#allocation5 + $0x168] ss:$12 sps:$4 sm:$0xff]  }
  0x56   :  { %1141 = vmatprep.subr.bf16.mxu0 %v4458_v11  ;;  %1181 = vmatpush1.bf16.msra.mxu1 %v4457_v12  ;;  %v4485_v29 = vld [vmem:[#allocation5 + $0x184] ss:$12 sps:$4 sm:$0xff]   ;;  %v4488_v31 = vld [vmem:[#allocation5 + $0x16c] ss:$12 sps:$4 sm:$0xff]   ;;  %v4494_v35 = vld [vmem:[#allocation5 + $0x154] ss:$12 sps:$4 sm:$0xff]  }
  0x57   :  { %1182 = vmatprep.subr.bf16.mxu1 %v4461_v13  ;;  %v4491_v33 = vld [vmem:[#allocation5 + $0x2ec] ss:$12 sps:$4 sm:$0xff]   ;;  %v4493_v36 = vld [vmem:[#allocation5 + $0x2e8] ss:$12 sps:$4 sm:$0xff]   ;;  %v4496_v38 = vld [vmem:[#allocation5 + $0x150] ss:$12 sps:$4 sm:$0xff]  }
  0x58   :  { %v4497_v37 = vld [vmem:[#allocation5 + $0x2d4] ss:$12 sps:$4 sm:$0xff]   ;;  %v4500_v39 = vld [vmem:[#allocation5 + $0x13c] ss:$12 sps:$4 sm:$0xff]   ;;  %v4502_v42 = vld [vmem:[#allocation5 + $0x138] ss:$12 sps:$4 sm:$0xff]  }
  0x59   :  { %1142 = vmatpush1.bf16.msra.mxu0 %v4460_v14  ;;  %v4499_v40 = vld [vmem:[#allocation5 + $0x2d0] ss:$12 sps:$4 sm:$0xff]   ;;  %v4505_v44 = vld [vmem:[#allocation5 + $0x2b8] ss:$12 sps:$4 sm:$0xff]   ;;  %v4508_v47 = vld [vmem:[#allocation5 + $0x120] ss:$12 sps:$4 sm:$0xff]  }
  0x5a   :  { %1143 = vmatprep.subr.bf16.mxu0 %v4464_v15  ;;  %1183 = vmatpush1.bf16.msra.mxu1 %v4463_v16  ;;  %v4503_v41 = vld [vmem:[#allocation5 + $0x2bc] ss:$12 sps:$4 sm:$0xff]   ;;  %v4506_v43 = vld [vmem:[#allocation5 + $0x124] ss:$12 sps:$4 sm:$0xff]   ;;  %v4512_v49 = vld [vmem:[#allocation5 + $0x10c] ss:$12 sps:$4 sm:$0xff]  }
  0x5b   :  { %1184 = vmatprep.subr.bf16.mxu1 %v4467_v17  ;;  %v4509_v45 = vld [vmem:[#allocation5 + $0x2a4] ss:$12 sps:$4 sm:$0xff]   ;;  %v4511_v51 = vld [vmem:[#allocation5 + $0x2a0] ss:$12 sps:$4 sm:$0xff]   ;;  %v4514_v54 = vld [vmem:[#allocation5 + $0x108] ss:$12 sps:$4 sm:$0xff]  }
  0x5c   :  { %v121_v46 = vld [vmem:[#allocation2 + $0x8] sm:$0xff]  ;;  %v123_v50 = vld [vmem:[#allocation2 + $0x18] sm:$0xff]  ;;  %v4515_v53 = vld [vmem:[#allocation5 + $0x28c] ss:$12 sps:$4 sm:$0xff]   ;;  %vm5110_vm0 = vmmov 0   ;;  %vm1131_vm1 = vcmask 130048  }
  0x5d   :  { %1144 = vmatpush1.bf16.msra.mxu0 %v4466_v18  ;;  %v128_v48 = vpack.c.bf16 %v121_v46, %v121_v46  ;;  %v5202_v52 = vpack.c.bf16 %v123_v50, %v123_v50  ;;  %v4518_v55 = vld [vmem:[#allocation5 + $0xf4] ss:$12 sps:$4 sm:$0xff]   ;;  %v4520_v58 = vld [vmem:[#allocation5 + $0xf0] ss:$12 sps:$4 sm:$0xff]   ;;  %v4526_v62 = vld [vmem:[#allocation5 + $0xd8] ss:$12 sps:$4 sm:$0xff]  }
  0x5e   :  { %1145 = vmatprep.subr.bf16.mxu0 %v4470_v19  ;;  %1185 = vmatpush1.bf16.msra.mxu1 %v4469_v20  ;;  %v4517_v56 = vld [vmem:[#allocation5 + $0x288] ss:$12 sps:$4 sm:$0xff]   ;;  %v4523_v60 = vld [vmem:[#allocation5 + $0x270] ss:$12 sps:$4 sm:$0xff]   ;;  %v4529_v63 = vld [vmem:[#allocation5 + $0x258] ss:$12 sps:$4 sm:$0xff]  }
  0x5f   :  { %1186 = vmatprep.subr.bf16.mxu1 %v4473_v21  ;;  %1167 = vmatprep.mubr.bf16.mxu0 %v128_v48  ;;  %v4521_v57 = vld [vmem:[#allocation5 + $0x274] ss:$12 sps:$4 sm:$0xff]   ;;  %v4524_v59 = vld [vmem:[#allocation5 + $0xdc] ss:$12 sps:$4 sm:$0xff]   ;;  %v4530_v0 = vld [vmem:[#allocation5 + $0xc4] ss:$12 sps:$4 sm:$0xff]  }
  0x60   :  { %1208 = vmatprep.mubr.bf16.mxu1 %v5202_v52  ;;  %v4527_v61 = vld [vmem:[#allocation5 + $0x25c] ss:$12 sps:$4 sm:$0xff]   ;;  %v4532_v1 = vld [vmem:[#allocation5 + $0xc0] ss:$12 sps:$4 sm:$0xff]   ;;  %v4533_v2 = vld [vmem:[#allocation5 + $0x244] ss:$12 sps:$4 sm:$0xff]  }
  0x61   :  { %1146 = vmatpush1.bf16.msra.mxu0 %v4472_v22  ;;  %v4535_v3 = vld [vmem:[#allocation5 + $0x240] ss:$12 sps:$4 sm:$0xff]   ;;  %v122_v6 = vld [vmem:[#allocation2 + $0x10] sm:$0xff]  ;;  %v4536_v9 = vld [vmem:[#allocation5 + $0x3a8] ss:$12 sps:$4 sm:$0xff]   ;;  %s5111_s12 = smov [#allocation13]  }
  0x62   :  { %1147 = vmatprep.subr.bf16.mxu0 %v4476_v23  ;;  %1187 = vmatpush1.bf16.msra.mxu1 %v4475_v24  ;;  %v120_v4 = vld [vmem:[#allocation2] sm:$0xff]  ;;  %v4542_v8 = vld [vmem:[#allocation5 + $0x170] ss:$12 sps:$4 sm:$0xff]   ;;  %v5207_v10 = vpack.c.bf16 %v122_v6, %v122_v6  ;;  %v4541_v11 = vld [vmem:[#allocation5 + $0x394] ss:$12 sps:$4 sm:$0xff]   ;;  %s3746_s13 = sshll.u32 %s5111_s12, 4  ;;  %s3747_s13 = int_to_ptr.vmem [resolvable:$true] %s3746_s13 }
  0x63   :  { %1188 = vmatprep.subr.bf16.mxu1 %v4479_v25  ;;  %v4538_v5 = vld [vmem:[#allocation5 + $0x3ac] ss:$12 sps:$4 sm:$0xff]   ;;  %v5205_v7 = vpack.c.bf16 %v120_v4, %v120_v4  ;;  %v4543_v12 = vld [vmem:[#allocation5 + $0xb0] ss:$12 sps:$4 sm:$0xff]   ;;  %v4557_v21 = vld [vmem:[#allocation5 + $0x128] ss:$12 sps:$4 sm:$0xff]   ;;  %p5073_p3 = scmp.lt.s32.totalorder %s3747_s13, %s3747_s13 }
  0x64   :  { %v4547_v13 = vld [vmem:[#allocation5 + $0x158] ss:$12 sps:$4 sm:$0xff]   ;;  %v4539_v14 = vld [vmem:[#allocation5 + $0x390] ss:$12 sps:$4 sm:$0xff]   ;;  %v4552_v17 = vld [vmem:[#allocation5 + $0x140] ss:$12 sps:$4 sm:$0xff]  }
  0x65   :  { %1148 = vmatpush1.bf16.msra.mxu0 %v4478_v26  ;;  %v4546_v15 = vld [vmem:[#allocation5 + $0x37c] ss:$12 sps:$4 sm:$0xff]   ;;  %v4548_v16 = vld [vmem:[#allocation5 + $0x98] ss:$12 sps:$4 sm:$0xff]   ;;  %v4553_v20 = vld [vmem:[#allocation5 + $0x80] ss:$12 sps:$4 sm:$0xff]  }
  0x66   :  { %1149 = vmatprep.subr.bf16.mxu0 %v4482_v27  ;;  %1189 = vmatpush1.bf16.msra.mxu1 %v4481_v28  ;;  %v4544_v18 = vld [vmem:[#allocation5 + $0x378] ss:$12 sps:$4 sm:$0xff]   ;;  %v4549_v22 = vld [vmem:[#allocation5 + $0x360] ss:$12 sps:$4 sm:$0xff]   ;;  %v4558_v24 = vld [vmem:[#allocation5 + $0x68] ss:$12 sps:$4 sm:$0xff]  }
  0x67   :  { %1190 = vmatprep.subr.bf16.mxu1 %v4485_v29  ;;  %v4551_v19 = vld [vmem:[#allocation5 + $0x364] ss:$12 sps:$4 sm:$0xff]   ;;  %v4556_v23 = vld [vmem:[#allocation5 + $0x34c] ss:$12 sps:$4 sm:$0xff]   ;;  %v4554_v26 = vld [vmem:[#allocation5 + $0x348] ss:$12 sps:$4 sm:$0xff]  }
  0x68   :  { %v4562_v25 = vld [vmem:[#allocation5 + $0x110] ss:$12 sps:$4 sm:$0xff]   ;;  %v4561_v27 = vld [vmem:[#allocation5 + $0x334] ss:$12 sps:$4 sm:$0xff]   ;;  %v4567_v29 = vld [vmem:[#allocation5 + $0xf8] ss:$12 sps:$4 sm:$0xff]  }
  0x69   :  { %1150 = vmatpush1.bf16.msra.mxu0 %v4484_v30  ;;  %v4563_v28 = vld [vmem:[#allocation5 + $0x50] ss:$12 sps:$4 sm:$0xff]   ;;  %v4588_v50 = vld [vmem:[#allocation5 + $0x218] ss:$12 sps:$4 sm:$0xff]   ;;  %v4613_v6 = vld [vmem:[#allocation5 + $0x1a0] ss:$12 sps:$4 sm:$0xff]  }
  0x6a   :  { %1151 = vmatprep.subr.bf16.mxu0 %v4488_v31  ;;  %1191 = vmatpush1.bf16.msra.mxu1 %v4487_v32  ;;  %v4559_v30 = vld [vmem:[#allocation5 + $0x330] ss:$12 sps:$4 sm:$0xff]   ;;  %v4568_v32 = vld [vmem:[#allocation5 + $0x38] ss:$12 sps:$4 sm:$0xff]   ;;  %s5068_s14 = scalar_lea.vmem %s3747_s13, 128 }
  0x6b   :  { %1192 = vmatprep.subr.bf16.mxu1 %v4491_v33  ;;  %v4566_v31 = vld [vmem:[#allocation5 + $0x31c] ss:$12 sps:$4 sm:$0xff]   ;;  %v4572_v33 = vld [vmem:[#allocation5 + $0xe0] ss:$12 sps:$4 sm:$0xff]   ;;  %v4604_v4 = vld [vmem:[#allocation5 + $0x3d8] ss:$12 sps:$4 sm:$0xff]   ;;  %p5069_p2 = scmp.ne.s32.totalorder %s3747_s13, %s5068_s14  ;;  %p5074_p4 = scmp.lt.s32.totalorder %s5068_s14, %s5068_s14 }
  0x6c   :  { %v4583_v46 = vld [vmem:[#allocation5 + $0x230] ss:$12 sps:$4 sm:$0xff]  }
  0x6d   :  { %1152 = vmatpush2.bf16.msra.mxu0 %v4490_v34  ;;  %v4564_v34 = vld [vmem:[#allocation5 + $0x318] ss:$12 sps:$4 sm:$0xff]   ;;  %p5075_p5 = por %p5074_p4, %p5073_p3 }
  0x6e   :  { %1153 = vmatprep.subr.bf16.mxu0 %v4494_v35  ;;  %1193 = vmatpush2.bf16.msra.mxu1 %v4493_v36  ;;  %v4571_v35 = vld [vmem:[#allocation5 + $0x304] ss:$12 sps:$4 sm:$0xff]   ;;  %v4573_v36 = vld [vmem:[#allocation5 + $0x20] ss:$12 sps:$4 sm:$0xff]  }
  0x6f   :  { %1194 = vmatprep.subr.bf16.mxu1 %v4497_v37  ;;  %v4577_v37 = vld [vmem:[#allocation5 + $0xc8] ss:$12 sps:$4 sm:$0xff]   ;;  %p5076_p6 = pnand %p5075_p5, %p5069_p2 }
  0x71   :  { %1154 = vmatpush2.bf16.msra.mxu0 %v4496_v38  ;;  %v4569_v38 = vld [vmem:[#allocation5 + $0x300] ss:$12 sps:$4 sm:$0xff]  }
  0x72   :  { %1155 = vmatprep.subr.bf16.mxu0 %v4500_v39  ;;  %1195 = vmatpush2.bf16.msra.mxu1 %v4499_v40  ;;  %v4576_v39 = vld [vmem:[#allocation5 + $0x46c] ss:$12 sps:$4 sm:$0xff]   ;;  %v4578_v40 = vld [vmem:[#allocation5 + $0x8] ss:$12 sps:$4 sm:$0xff]  }
  0x73   :  { %1196 = vmatprep.subr.bf16.mxu1 %v4503_v41  ;;  %v4582_v41 = vld [vmem:[#allocation5 + $0x2f0] ss:$12 sps:$4 sm:$0xff]  }
  0x75   :  { %1156 = vmatpush2.bf16.msra.mxu0 %v4502_v42  ;;  %v125_v42 = vld [vmem:[#allocation2 + $0x28] sm:$0xff] }
  0x76   :  { %1157 = vmatprep.subr.bf16.mxu0 %v4506_v43  ;;  %1197 = vmatpush2.bf16.msra.mxu1 %v4505_v44  ;;  %v4574_v43 = vld [vmem:[#allocation5 + $0x468] ss:$12 sps:$4 sm:$0xff]   ;;  %v5211_v44 = vpack.c.bf16 %v125_v42, %v125_v42  ;;  %v4631_v42 = vld [vmem:[#allocation5 + $0x3e0] ss:$12 sps:$4 sm:$0xff]  }
  0x77   :  { %1198 = vmatprep.subr.bf16.mxu1 %v4509_v45  ;;  %v4581_v45 = vld [vmem:[#allocation5 + $0x454] ss:$12 sps:$4 sm:$0xff]  }
  0x79   :  { %1158 = vmatpush2.bf16.msra.mxu0 %v4508_v47  ;;  %v4587_v47 = vld [vmem:[#allocation5 + $0x2d8] ss:$12 sps:$4 sm:$0xff]  }
  0x7a   :  { %1159 = vmatprep.subr.bf16.mxu0 %v4512_v49  ;;  %1199 = vmatpush2.bf16.msra.mxu1 %v4511_v51  ;;  %v4586_v49 = vld [vmem:[#allocation5 + $0x43c] ss:$12 sps:$4 sm:$0xff]   ;;  %v4592_v51 = vld [vmem:[#allocation5 + $0x2c0] ss:$12 sps:$4 sm:$0xff]  }
  0x7b   :  { %1200 = vmatprep.subr.bf16.mxu1 %v4515_v53  ;;  %v4584_v53 = vld [vmem:[#allocation5 + $0x438] ss:$12 sps:$4 sm:$0xff]  }
  0x7d   :  { %1160 = vmatpush2.bf16.msra.mxu0 %v4514_v54  ;;  %v4591_v54 = vld [vmem:[#allocation5 + $0x424] ss:$12 sps:$4 sm:$0xff]  }
  0x7e   :  { %1161 = vmatprep.subr.bf16.mxu0 %v4518_v55  ;;  %1201 = vmatpush2.bf16.msra.mxu1 %v4517_v56  ;;  %v4593_v55 = vld [vmem:[#allocation5 + $0x200] ss:$12 sps:$4 sm:$0xff]   ;;  %v4597_v56 = vld [vmem:[#allocation5 + $0x2a8] ss:$12 sps:$4 sm:$0xff]  }
  0x7f   :  { %1202 = vmatprep.subr.bf16.mxu1 %v4521_v57  ;;  %v4589_v57 = vld [vmem:[#allocation5 + $0x420] ss:$12 sps:$4 sm:$0xff]  }
  0x81   :  { %1162 = vmatpush2.bf16.msra.mxu0 %v4520_v58  ;;  %v4596_v58 = vld [vmem:[#allocation5 + $0x40c] ss:$12 sps:$4 sm:$0xff]  }
  0x82   :  { %1163 = vmatprep.subr.bf16.mxu0 %v4524_v59  ;;  %1203 = vmatpush2.bf16.msra.mxu1 %v4523_v60  ;;  %v4598_v59 = vld [vmem:[#allocation5 + $0x1e8] ss:$12 sps:$4 sm:$0xff]   ;;  %v4602_v60 = vld [vmem:[#allocation5 + $0x290] ss:$12 sps:$4 sm:$0xff]  }
  0x83   :  { %1204 = vmatprep.subr.bf16.mxu1 %v4527_v61  ;;  %v4601_v61 = vld [vmem:[#allocation5 + $0x3f4] ss:$12 sps:$4 sm:$0xff]  }
  0x85   :  { %1164 = vmatpush2.bf16.msra.mxu0 %v4526_v62  ;;  %v4599_v62 = vld [vmem:[#allocation5 + $0x3f0] ss:$12 sps:$4 sm:$0xff]  }
  0x86   :  { %1165 = vmatprep.subr.bf16.mxu0 %v4530_v0  ;;  %1205 = vmatpush2.bf16.msra.mxu1 %v4529_v63  ;;  %v4603_v63 = vld [vmem:[#allocation5 + $0x1d0] ss:$12 sps:$4 sm:$0xff]   ;;  %v4607_v0 = vld [vmem:[#allocation5 + $0x278] ss:$12 sps:$4 sm:$0xff]  }
  0x87   :  { %1206 = vmatprep.subr.bf16.mxu1 %v4533_v2  ;;  %v4608_v2 = vld [vmem:[#allocation5 + $0x1b8] ss:$12 sps:$4 sm:$0xff]  }
  0x89   :  { %1166 = vmatpush2.bf16.msra.mxu0 %v4532_v1  ;;  %v4606_v1 = vld [vmem:[#allocation5 + $0x3dc] ss:$12 sps:$4 sm:$0xff]  }
  0x8a   :  { %1217 = vmatprep.subr.bf16.mxu0 %v4538_v5  ;;  %1207 = vmatpush2.bf16.msra.mxu1 %v4535_v3  ;;  %v4612_v3 = vld [vmem:[#allocation5 + $0x260] ss:$12 sps:$4 sm:$0xff]   ;;  %v4611_v5 = vld [vmem:[#allocation5 + $0x3c4] ss:$12 sps:$4 sm:$0xff]  }
  0x8b   :  { %4148 = vmatprep.subr.bf16.mxu1 %v4542_v8  ;;  %v4609_v8 = vld [vmem:[#allocation5 + $0x3c0] ss:$12 sps:$4 sm:$0xff]  }
  0x8c   :  { %1168 = vmatmul.mubr.bf16.vlgmr.msra.gmra.mxu0 %v5205_v7 }
  0x8d   :  { %1218 = vmatpush1.bf16.msra.mxu0 %v4536_v9  ;;  %1209 = vmatmul.mubr.bf16.vlgmr.msra.gmra.mxu1 %v5207_v10  ;;  %v124_v9 = vld [vmem:[#allocation2 + $0x20] sm:$0xff] }
  0x8e   :  { %1219 = vmatprep.subr.bf16.mxu0 %v4541_v11  ;;  %4149 = vmatpush3.bf16.msra.mxu1 %v4543_v12  ;;  %v4616_v11 = vld [vmem:[#allocation5 + $0x484] ss:$12 sps:$4 sm:$0xff]   ;;  %v4618_v12 = vld [vmem:[#allocation5 + $0x188] ss:$12 sps:$4 sm:$0xff]  }
  0x8f   :  { %1331 = vmatprep.mubr.bf16.mxu1 %v128_v48  ;;  %4150 = vmatprep.subr.bf16.mxu1 %v4547_v13  ;;  %v4579_v48 = vld [vmem:[#allocation5 + $0x450] ss:$12 sps:$4 sm:$0xff]   ;;  %v4614_v13 = vld [vmem:[#allocation5 + $0x480] ss:$12 sps:$4 sm:$0xff]  }
  0x90   :  { %1249 = vmatprep.mubr.bf16.mxu0 %v5211_v44 }
  0x91   :  { %1220 = vmatpush1.bf16.msra.mxu0 %v4539_v14  ;;  %v5216_v14 = vpack.c.bf16 %v124_v9, %v124_v9  ;;  %v4698_v9 = vld [vmem:[#allocation7 + $0x1e4] ss:$12 sps:$4 sm:$0xff]  }
  0x92   :  { %1221 = vmatprep.subr.bf16.mxu0 %v4546_v15  ;;  %4151 = vmatpush3.bf16.msra.mxu1 %v4548_v16  ;;  %v4619_v15 = vld [vmem:[#allocation5 + $0x470] ss:$12 sps:$4 sm:$0xff]   ;;  %v4635_v16 = vld [vmem:[#allocation5 + $0x488] ss:$12 sps:$4 sm:$0xff]  }
  0x93   :  { %4152 = vmatprep.subr.bf16.mxu1 %v4552_v17  ;;  %v126_v17 = vld [vmem:[#allocation2 + $0x30] sm:$0xff] }
  0x95   :  { %1222 = vmatpush1.bf16.msra.mxu0 %v4544_v18  ;;  %v5108_v18 = vmov 0.0  }
  0x96   :  { %1223 = vmatprep.subr.bf16.mxu0 %v4551_v19  ;;  %4153 = vmatpush3.bf16.msra.mxu1 %v4553_v20  ;;  %v5109_v19 = vmov 0   ;;  %v4620_v20 = vld [vmem:[#allocation5 + $0x3b0] ss:$12 sps:$4 sm:$0xff]  }
  0x97   :  { %4154 = vmatprep.subr.bf16.mxu1 %v4557_v21  ;;  %v133_v21 = vpack.c.bf16 %v126_v17, %v126_v17  ;;  %v4708_v17 = vld [vmem:[#allocation7 + $0x198] ss:$12 sps:$4 sm:$0xff]  }
  0x99   :  { %1224 = vmatpush1.bf16.msra.mxu0 %v4549_v22  ;;  %v4621_v22 = vld [vmem:[#allocation5 + $0x458] ss:$12 sps:$4 sm:$0xff]  }
  0x9a   :  { %1225 = vmatprep.subr.bf16.mxu0 %v4556_v23  ;;  %4155 = vmatpush3.bf16.msra.mxu1 %v4558_v24  ;;  %v4638_v23 = vld [vmem:[#allocation7 + $0xac] ss:$12 sps:$4 sm:$0xff]   ;;  %v4636_v24 = vld [vmem:[#allocation7 + $0xa8] ss:$12 sps:$4 sm:$0xff]  }
  0x9b   :  { %4156 = vmatprep.subr.bf16.mxu1 %v4562_v25  ;;  %v4641_v25 = vld [vmem:[#allocation7 + $0x94] ss:$12 sps:$4 sm:$0xff]  }
  0x9d   :  { %1226 = vmatpush1.bf16.msra.mxu0 %v4554_v26  ;;  %v4622_v26 = vld [vmem:[#allocation5 + $0x398] ss:$12 sps:$4 sm:$0xff]  }
  0x9e   :  { %1227 = vmatprep.subr.bf16.mxu0 %v4561_v27  ;;  %4157 = vmatpush3.bf16.msra.mxu1 %v4563_v28  ;;  %v4639_v27 = vld [vmem:[#allocation7 + $0x90] ss:$12 sps:$4 sm:$0xff]   ;;  %v4624_v28 = vld [vmem:[#allocation5 + $0x380] ss:$12 sps:$4 sm:$0xff]  }
  0x9f   :  { %4158 = vmatprep.subr.bf16.mxu1 %v4567_v29  ;;  %v4625_v29 = vld [vmem:[#allocation5 + $0x428] ss:$12 sps:$4 sm:$0xff]  }
  0xa1   :  { %1228 = vmatpush1.bf16.msra.mxu0 %v4559_v30  ;;  %v4644_v30 = vld [vmem:[#allocation7 + $0x7c] ss:$12 sps:$4 sm:$0xff]  }
  0xa2   :  { %1229 = vmatprep.subr.bf16.mxu0 %v4566_v31  ;;  %4159 = vmatpush3.bf16.msra.mxu1 %v4568_v32  ;;  %v4642_v31 = vld [vmem:[#allocation7 + $0x78] ss:$12 sps:$4 sm:$0xff]  }
  0xa3   :  { %4160 = vmatprep.subr.bf16.mxu1 %v4572_v33  ;;  %v4647_v32 = vld [vmem:[#allocation7 + $0x64] ss:$12 sps:$4 sm:$0xff]  }
  0xa4   :  { %v4626_v33 = vld [vmem:[#allocation5 + $0x368] ss:$12 sps:$4 sm:$0xff]  }
  0xa5   :  { %1230 = vmatpush1.bf16.msra.mxu0 %v4564_v34  ;;  %v4627_v34 = vld [vmem:[#allocation5 + $0x410] ss:$12 sps:$4 sm:$0xff]  }
  0xa6   :  { %1231 = vmatprep.subr.bf16.mxu0 %v4571_v35  ;;  %4161 = vmatpush3.bf16.msra.mxu1 %v4573_v36  ;;  %v4645_v35 = vld [vmem:[#allocation7 + $0x60] ss:$12 sps:$4 sm:$0xff]  }
  0xa7   :  { %4162 = vmatprep.subr.bf16.mxu1 %v4577_v37  ;;  %v4650_v36 = vld [vmem:[#allocation7 + $0x4c] ss:$12 sps:$4 sm:$0xff]  }
  0xa8   :  { %v4628_v37 = vld [vmem:[#allocation5 + $0x350] ss:$12 sps:$4 sm:$0xff]  }
  0xa9   :  { %1232 = vmatpush1.bf16.msra.mxu0 %v4569_v38  ;;  %v4629_v38 = vld [vmem:[#allocation5 + $0x3f8] ss:$12 sps:$4 sm:$0xff]  }
  0xaa   :  { %1233 = vmatprep.subr.bf16.mxu0 %v4576_v39  ;;  %4163 = vmatpush3.bf16.msra.mxu1 %v4578_v40  ;;  %v4648_v39 = vld [vmem:[#allocation7 + $0x48] ss:$12 sps:$4 sm:$0xff]  }
  0xab   :  { %4170 = vmatprep.subr.bf16.mxu1 %v4582_v41  ;;  %v4653_v40 = vld [vmem:[#allocation7 + $0x34] ss:$12 sps:$4 sm:$0xff]  }
  0xac   :  { %v4630_v41 = vld [vmem:[#allocation5 + $0x338] ss:$12 sps:$4 sm:$0xff]  }
  0xad   :  { %1234 = vmatpush2.bf16.msra.mxu0 %v4574_v43  ;;  %1332 = vmatmul.mubr.bf16.vlgmr.msra.gmra.mxu1 %v5205_v7  ;;  %v4617_v7 = vld [vmem:[#allocation5 + $0x248] ss:$12 sps:$4 sm:$0xff]  }
  0xae   :  { %1235 = vmatprep.subr.bf16.mxu0 %v4581_v45  ;;  %4171 = vmatpush3.bf16.msra.mxu1 %v4583_v46  ;;  %v4651_v43 = vld [vmem:[#allocation7 + $0x30] ss:$12 sps:$4 sm:$0xff]   ;;  %v4632_v45 = vld [vmem:[#allocation5 + $0x320] ss:$12 sps:$4 sm:$0xff]  }
  0xaf   :  { %1371 = vmatprep.mubr.bf16.mxu1 %v5202_v52  ;;  %4172 = vmatprep.subr.bf16.mxu1 %v4587_v47  ;;  %v4594_v52 = vld [vmem:[#allocation5 + $0x408] ss:$12 sps:$4 sm:$0xff]   ;;  %v4654_v47 = vld [vmem:[#allocation7 + $0x18] ss:$12 sps:$4 sm:$0xff]  }
  0xb0   :  { %v4633_v46 = vld [vmem:[#allocation5 + $0x3c8] ss:$12 sps:$4 sm:$0xff]  }
  0xb1   :  { %1236 = vmatpush2.bf16.msra.mxu0 %v4579_v48  ;;  %v4659_v48 = vld [vmem:[#allocation7 + $0x4] ss:$12 sps:$4 sm:$0xff]  }
  0xb2   :  { %1237 = vmatprep.subr.bf16.mxu0 %v4586_v49  ;;  %4173 = vmatpush3.bf16.msra.mxu1 %v4588_v50  ;;  %v4634_v49 = vld [vmem:[#allocation5 + $0x308] ss:$12 sps:$4 sm:$0xff]   ;;  %v4657_v50 = vld [vmem:[#allocation7] ss:$12 sps:$4 sm:$0xff]  }
  0xb3   :  { %4174 = vmatprep.subr.bf16.mxu1 %v4592_v51  ;;  %v4662_v51 = vld [vmem:[#allocation7 + $0x16c] ss:$12 sps:$4 sm:$0xff]  }
  0xb5   :  { %1238 = vmatpush2.bf16.msra.mxu0 %v4584_v53  ;;  %v4660_v53 = vld [vmem:[#allocation7 + $0x168] ss:$12 sps:$4 sm:$0xff]  }
  0xb6   :  { %1239 = vmatprep.subr.bf16.mxu0 %v4591_v54  ;;  %4175 = vmatpush3.bf16.msra.mxu1 %v4593_v55  ;;  %v4665_v54 = vld [vmem:[#allocation7 + $0x154] ss:$12 sps:$4 sm:$0xff]   ;;  %v4663_v55 = vld [vmem:[#allocation7 + $0x150] ss:$12 sps:$4 sm:$0xff]  }
  0xb7   :  { %4176 = vmatprep.subr.bf16.mxu1 %v4597_v56  ;;  %v4668_v56 = vld [vmem:[#allocation7 + $0x13c] ss:$12 sps:$4 sm:$0xff]  }
  0xb9   :  { %1240 = vmatpush2.bf16.msra.mxu0 %v4589_v57  ;;  %v4666_v57 = vld [vmem:[#allocation7 + $0x138] ss:$12 sps:$4 sm:$0xff]  }
  0xba   :  { %1241 = vmatprep.subr.bf16.mxu0 %v4596_v58  ;;  %4177 = vmatpush3.bf16.msra.mxu1 %v4598_v59  ;;  %v4671_v58 = vld [vmem:[#allocation7 + $0x124] ss:$12 sps:$4 sm:$0xff]   ;;  %v4669_v59 = vld [vmem:[#allocation7 + $0x120] ss:$12 sps:$4 sm:$0xff]  }
  0xbb   :  { %4178 = vmatprep.subr.bf16.mxu1 %v4602_v60  ;;  %v4674_v60 = vld [vmem:[#allocation7 + $0x10c] ss:$12 sps:$4 sm:$0xff]  }
  0xbd   :  { %1242 = vmatpush2.bf16.msra.mxu0 %v4594_v52  ;;  %v4672_v52 = vld [vmem:[#allocation7 + $0x108] ss:$12 sps:$4 sm:$0xff]  }
  0xbe   :  { %1243 = vmatprep.subr.bf16.mxu0 %v4601_v61  ;;  %4179 = vmatpush3.bf16.msra.mxu1 %v4603_v63  ;;  %v4677_v61 = vld [vmem:[#allocation7 + $0xf4] ss:$12 sps:$4 sm:$0xff]   ;;  %v4680_v63 = vld [vmem:[#allocation7 + $0xdc] ss:$12 sps:$4 sm:$0xff]  }
  0xbf   :  { %4180 = vmatprep.subr.bf16.mxu1 %v4607_v0  ;;  %v4678_v0 = vld [vmem:[#allocation7 + $0xd8] ss:$12 sps:$4 sm:$0xff]  }
  0xc1   :  { %1244 = vmatpush2.bf16.msra.mxu0 %v4599_v62  ;;  %v4675_v62 = vld [vmem:[#allocation7 + $0xf0] ss:$12 sps:$4 sm:$0xff]  }
  0xc2   :  { %1245 = vmatprep.subr.bf16.mxu0 %v4606_v1  ;;  %4181 = vmatpush3.bf16.msra.mxu1 %v4608_v2  ;;  %v4683_v1 = vld [vmem:[#allocation7 + $0xc4] ss:$12 sps:$4 sm:$0xff]   ;;  %v4681_v2 = vld [vmem:[#allocation7 + $0xc0] ss:$12 sps:$4 sm:$0xff]  }
  0xc3   :  { %4182 = vmatprep.subr.bf16.mxu1 %v4612_v3  ;;  %v4684_v3 = vld [vmem:[#allocation7 + $0x228] ss:$12 sps:$4 sm:$0xff]  }
  0xc5   :  { %1246 = vmatpush2.bf16.msra.mxu0 %v4604_v4  ;;  %v4686_v4 = vld [vmem:[#allocation7 + $0x22c] ss:$12 sps:$4 sm:$0xff]  }
  0xc6   :  { %1247 = vmatprep.subr.bf16.mxu0 %v4611_v5  ;;  %4183 = vmatpush3.bf16.msra.mxu1 %v4613_v6  ;;  %v4690_v5 = vld [vmem:[#allocation7 + $0x214] ss:$12 sps:$4 sm:$0xff]   ;;  %v4688_v6 = vld [vmem:[#allocation7 + $0x210] ss:$12 sps:$4 sm:$0xff]  }
  0xc7   :  { %4184 = vmatprep.subr.bf16.mxu1 %v4617_v7  ;;  %v4694_v7 = vld [vmem:[#allocation7 + $0x1fc] ss:$12 sps:$4 sm:$0xff]  }
  0xc9   :  { %1248 = vmatpush2.bf16.msra.mxu0 %v4609_v8  ;;  %v4692_v8 = vld [vmem:[#allocation7 + $0x1f8] ss:$12 sps:$4 sm:$0xff]  }
  0xca   :  { %1272 = vmatprep.subr.bf16.mxu0 %v4616_v11  ;;  %4185 = vmatpush3.bf16.msra.mxu1 %v4618_v12  ;;  %v4696_v11 = vld [vmem:[#allocation7 + $0x1e0] ss:$12 sps:$4 sm:$0xff]  }
  0xcb   :  { %4340 = vmatprep.subr.bf16.mxu1 %v5108_v18  ;;  %v4702_v12 = vld [vmem:[#allocation7 + $0x1cc] ss:$12 sps:$4 sm:$0xff]  }
  0xcc   :  { %1250 = vmatmul.mubr.bf16.vlgmr.msra.gmra.mxu0 %v5216_v14 }
  0xcd   :  { %1273 = vmatpush1.bf16.msra.mxu0 %v4614_v13  ;;  %1290 = vmatprep.mubr.bf16.mxu0 %v5109_v19  ;;  %v4700_v13 = vld [vmem:[#allocation7 + $0x1c8] ss:$12 sps:$4 sm:$0xff]  }
  0xce   :  { %1372 = vmatmul.mubr.bf16.vlgmr.msra.gmra.mxu1 %v5207_v10  ;;  %4192 = vmatprep.subr.bf16.mxu0 %v4619_v15  ;;  %v4623_v10 = vld [vmem:[#allocation5 + $0x440] ss:$12 sps:$4 sm:$0xff]   ;;  %v4704_v15 = vld [vmem:[#allocation7 + $0x1b0] ss:$12 sps:$4 sm:$0xff]  }
  0xcf   :  { %4341 = vmatpush3.bf16.msra.mxu1 %v4635_v16  ;;  %4342 = vmatprep.mubr.msk.bf16.mxu1 %vm5110_vm0, %v5108_v18  ;;  %v4710_v16 = vld [vmem:[#allocation7 + $0x19c] ss:$12 sps:$4 sm:$0xff]  }
  0xd0   :  { %1962 = vmatprep.subr.bf16.mxu1 %v4638_v23  ;;  %v4716_v23 = vld [vmem:[#allocation7 + $0x170] ss:$12 sps:$4 sm:$0xff]  }
  0xd4   :  { %3905 = vmatmul.mubr.msk.bf16.vlgmr.msra.gmra.mxu0 %vm1131_vm1, %v133_v21 }
  0xd5   :  { %4193 = vmatpush3.bf16.msra.mxu0 %v4620_v20  ;;  %1411 = vmatprep.mubr.bf16.mxu0 %v5211_v44  ;;  %v4656_v44 = vld [vmem:[#allocation7 + $0x1c] ss:$12 sps:$4 sm:$0xff]   ;;  %v4714_v20 = vld [vmem:[#allocation7 + $0x184] ss:$12 sps:$4 sm:$0xff]  }
  0xd6   :  { %4194 = vmatprep.subr.bf16.mxu0 %v4621_v22  ;;  %4343 = vmatmul.mubr.msk.bf16.vlgmr.msra.gmra.mxu1 %vm1131_vm1, %v133_v21  ;;  %v332_v21 = vlaneseq  ;;  %v4712_v22 = vld [vmem:[#allocation7 + $0x180] ss:$12 sps:$4 sm:$0xff]  }
  0xd7   :  { %1963 = vmatpush1.bf16.msra.mxu1 %v4636_v24 }
  0xd8   :  { %1964 = vmatprep.subr.bf16.mxu1 %v4641_v25  ;;  %v333_v24 = vshrl.u32 %v332_v21, 7 }
  0xd9   :  { %4195 = vmatpush3.bf16.msra.mxu0 %v4622_v26  ;;  %v5233_v26 = vld [vmem:[%s5324_s2] sm:$0x7] }
  0xda   :  { %4196 = vmatprep.subr.bf16.mxu0 %v4623_v10  ;;  %v5228_v25 = vsub.s32 0, %v333_v24  ;;  %v5235_v10 = vsub.s32 1, %v333_v24 }
  0xdb   :  { %1965 = vmatpush1.bf16.msra.mxu1 %v4639_v27 }
  0xdc   :  { %1966 = vmatprep.subr.bf16.mxu1 %v4644_v30  ;;  %v335_v27 = vrot.slane %v5233_v26, %v5228_v25 }
  0xdd   :  { %4197 = vmatpush3.bf16.msra.mxu0 %v4624_v28  ;;  %v339_v28 = vrot.slane %v5233_v26, %v5235_v10 }
  0xde   :  { %4198 = vmatprep.subr.bf16.mxu0 %v4625_v29 }
  0xdf   :  { %1967 = vmatpush1.bf16.msra.mxu1 %v4642_v31 }
  0xe0   :  { %1968 = vmatprep.subr.bf16.mxu1 %v4647_v32 }
  0xe1   :  { %4199 = vmatpush3.bf16.msra.mxu0 %v4626_v33 }
  0xe2   :  { %4200 = vmatprep.subr.bf16.mxu0 %v4627_v34 }
  0xe3   :  { %1969 = vmatpush1.bf16.msra.mxu1 %v4645_v35 }
  0xe4   :  { %1970 = vmatprep.subr.bf16.mxu1 %v4650_v36 }
  0xe5   :  { %4201 = vmatpush3.bf16.msra.mxu0 %v4628_v37 }
  0xe6   :  { %4202 = vmatprep.subr.bf16.mxu0 %v4629_v38 }
  0xe7   :  { %1971 = vmatpush1.bf16.msra.mxu1 %v4648_v39 }
  0xe8   :  { %1972 = vmatprep.subr.bf16.mxu1 %v4653_v40 }
  0xe9   :  { %4203 = vmatpush3.bf16.msra.mxu0 %v4630_v41 }
  0xea   :  { %4204 = vmatprep.subr.bf16.mxu0 %v4631_v42 }
  0xeb   :  { %1973 = vmatpush1.bf16.msra.mxu1 %v4651_v43 }
  0xec   :  { %1974 = vmatprep.subr.bf16.mxu1 %v4656_v44 }
  0xed   :  { %4205 = vmatpush3.bf16.msra.mxu0 %v4632_v45 }
  0xee   :  { %4206 = vmatprep.subr.bf16.mxu0 %v4633_v46 }
  0xef   :  { %1975 = vmatpush1.bf16.msra.mxu1 %v4654_v47 }
  0xf0   :  { %1976 = vmatprep.subr.bf16.mxu1 %v4659_v48 }
  0xf1   :  { %4207 = vmatpush3.bf16.msra.mxu0 %v4634_v49 }
  0xf2   :  { %2003 = vmatprep.subr.bf16.mxu0 %v4686_v4  ;;  %v4687_v4 = vld [vmem:[#allocation7 + $0x230] ss:$12 sps:$4 sm:$0xff]  }
  0xf3   :  { %1977 = vmatpush1.bf16.msra.mxu1 %v4657_v50 }
  0xf4   :  { %1412 = vmatmul.mubr.bf16.vlgmr.msra.gmra.mxu0 %v5216_v14  ;;  %1978 = vmatprep.subr.bf16.mxu1 %v4662_v51  ;;  %v4706_v14 = vld [vmem:[#allocation7 + $0x1b4] ss:$12 sps:$4 sm:$0xff]  }
  0xf5   :  { %2035 = vmatprep.mubr.bf16.mxu0 %v5109_v19  ;;  %2004 = vmatpush1.bf16.msra.mxu0 %v4684_v3 }
  0xf6   :  { %2005 = vmatprep.subr.bf16.mxu0 %v4690_v5 }
  0xf7   :  { %1979 = vmatpush2.bf16.msra.mxu1 %v4660_v53 }
  0xf8   :  { %1980 = vmatprep.subr.bf16.mxu1 %v4665_v54 }
  0xf9   :  { %2006 = vmatpush1.bf16.msra.mxu0 %v4688_v6 }
  0xfa   :  { %2007 = vmatprep.subr.bf16.mxu0 %v4694_v7  ;;  %v4691_v7 = vld [vmem:[#allocation7 + $0x218] ss:$12 sps:$4 sm:$0xff]  }
  0xfb   :  { %1981 = vmatpush2.bf16.msra.mxu1 %v4663_v55 }
  0xfc   :  { %1982 = vmatprep.subr.bf16.mxu1 %v4668_v56 }
  0xfd   :  { %2008 = vmatpush1.bf16.msra.mxu0 %v4692_v8  ;;  %v4695_v8 = vld [vmem:[#allocation7 + $0x200] ss:$12 sps:$4 sm:$0xff]  }
  0xfe   :  { %2009 = vmatprep.subr.bf16.mxu0 %v4698_v9  ;;  %v4699_v9 = vld [vmem:[#allocation7 + $0x1e8] ss:$12 sps:$4 sm:$0xff]  }
  0xff   :  { %1983 = vmatpush2.bf16.msra.mxu1 %v4666_v57 }
 0x100   :  { %1984 = vmatprep.subr.bf16.mxu1 %v4671_v58 }
 0x101   :  { %2010 = vmatpush1.bf16.msra.mxu0 %v4696_v11  ;;  %v5249_v11 = vsub.s32 2, %v333_v24  ;;  %v4715_v24 = vld [vmem:[#allocation7 + $0x188] ss:$12 sps:$4 sm:$0xff]  }
 0x102   :  { %2011 = vmatprep.subr.bf16.mxu0 %v4702_v12  ;;  %v4703_v12 = vld [vmem:[#allocation7 + $0x1d0] ss:$12 sps:$4 sm:$0xff]  }
 0x103   :  { %1985 = vmatpush2.bf16.msra.mxu1 %v4669_v59 }
 0x104   :  { %1986 = vmatprep.subr.bf16.mxu1 %v4674_v60 }
 0x105   :  { %2012 = vmatpush1.bf16.msra.mxu0 %v4700_v13  ;;  %v343_v13 = vrot.slane %v5233_v26, %v5249_v11 }
 0x106   :  { %2013 = vmatprep.subr.bf16.mxu0 %v4706_v14  ;;  %v4707_v14 = vld [vmem:[#allocation7 + $0x1b8] ss:$12 sps:$4 sm:$0xff]  }
 0x107   :  { %1987 = vmatpush2.bf16.msra.mxu1 %v4672_v52 }
 0x108   :  { %1988 = vmatprep.subr.bf16.mxu1 %v4677_v61 }
 0x109   :  { %2014 = vmatpush1.bf16.msra.mxu0 %v4704_v15 }
 0x10a   :  { %2015 = vmatprep.subr.bf16.mxu0 %v4710_v16 }
 0x10b   :  { %1989 = vmatpush2.bf16.msra.mxu1 %v4675_v62 }
 0x10c   :  { %1990 = vmatprep.subr.bf16.mxu1 %v4680_v63 }
 0x10d   :  { %2016 = vmatpush1.bf16.msra.mxu0 %v4708_v17  ;;  %v4711_v17 = vld [vmem:[#allocation7 + $0x1a0] ss:$12 sps:$4 sm:$0xff]  }
 0x10e   :  { %2017 = vmatprep.subr.bf16.mxu0 %v4714_v20 }
 0x10f   :  { %1991 = vmatpush2.bf16.msra.mxu1 %v4678_v0 }
 0x110   :  { %1992 = vmatprep.subr.bf16.mxu1 %v4683_v1 }
 0x111   :  { %2018 = vmatpush1.bf16.msra.mxu0 %v4712_v22 }
 0x112   :  { %4216 = vmatprep.subr.bf16.mxu0 %v4716_v23 }
 0x113   :  { %1993 = vmatpush2.bf16.msra.mxu1 %v4681_v2 }
 0x114   :  { %4346 = vmatprep.subr.bf16.mxu1 %v5108_v18 }
 0x14c   :  { %v1169_v29 = vpop.f32.mrf.mxu0 }
 0x14d   :  { %v1170_v30 = vadd.f32 %v1169_v29, %v335_v27  ;;  %v1210_v32 = vpop.f32.mrf.mxu1 }
 0x14e   :  { %v1171_v31 = vpop.f32.mrf.mxu0 }
 0x14f   :  { %v1172_v33 = vadd.f32 %v1171_v31, %v339_v28  ;;  %v1211_v34 = vadd.f32 %v1210_v32, %v1170_v30  ;;  %v1212_v36 = vpop.f32.mrf.mxu1  ;;  %v4717_v31 = vld [vmem:[#allocation7 + $0xb0] ss:$12 sps:$4 sm:$0xff]  }
 0x150   :  { %v1173_v35 = vpop.f32.mrf.mxu0 }
 0x151   :  { %v1213_v37 = vadd.f32 %v1212_v36, %v1172_v33  ;;  %v1214_v39 = vpop.f32.mrf.mxu1  ;;  %v4718_v33 = vld [vmem:[#allocation7 + $0x158] ss:$12 sps:$4 sm:$0xff]   ;;  %v4720_v35 = vld [vmem:[#allocation7 + $0x140] ss:$12 sps:$4 sm:$0xff]  }
 0x152   :  { %v1174_v38 = vpop.f32.mrf.mxu0  ;;  %v4721_v36 = vld [vmem:[#allocation7 + $0x80] ss:$12 sps:$4 sm:$0xff]   ;;  %v4724_v39 = vld [vmem:[#allocation7 + $0x110] ss:$12 sps:$4 sm:$0xff]  }
 0x153   :  { %v1215_v40 = vpop.f32.mrf.mxu1  ;;  %v4723_v38 = vld [vmem:[#allocation7 + $0x68] ss:$12 sps:$4 sm:$0xff]  }
 0x154   :  { %v4725_v40 = vld [vmem:[#allocation7 + $0x50] ss:$12 sps:$4 sm:$0xff]  }
 0x16d   :  { %v4164_v41 = vpop.f32.mrf.mxu1 }
 0x16f   :  { %v4165_v42 = vpop.f32.mrf.mxu1 }
 0x170   :  { %v4166_v43 = vadd.f32 %v4165_v42, %v4164_v41  ;;  %v4726_v41 = vld [vmem:[#allocation7 + $0xf8] ss:$12 sps:$4 sm:$0xff]  }
 0x171   :  { %v4167_v44 = vpop.f32.mrf.mxu1  ;;  %v4727_v42 = vld [vmem:[#allocation7 + $0x38] ss:$12 sps:$4 sm:$0xff]  }
 0x172   :  { %v1334_v15 = vadd.f32 %v4166_v43, %v343_v13  ;;  %v4728_v43 = vld [vmem:[#allocation7 + $0xe0] ss:$12 sps:$4 sm:$0xff]   ;;  %v4768_v13 = vld [vmem:[#allocation8 + $0x108] ss:$12 sps:$4 sm:$0xff]  }
 0x173   :  { %v4168_v45 = vpop.f32.mrf.mxu1  ;;  %v4729_v44 = vld [vmem:[#allocation7 + $0x20] ss:$12 sps:$4 sm:$0xff]  }
 0x174   :  { %v4730_v45 = vld [vmem:[#allocation7 + $0xc8] ss:$12 sps:$4 sm:$0xff]  }
 0x18c   :  { %v1251_v46 = vpop.f32.mrf.mxu0 }
 0x18d   :  { %v1252_v54 = vadd.f32 %v1251_v46, %v1211_v34  ;;  %v4719_v34 = vld [vmem:[#allocation7 + $0x98] ss:$12 sps:$4 sm:$0xff]   ;;  %v4731_v46 = vld [vmem:[#allocation7 + $0x8] ss:$12 sps:$4 sm:$0xff]  }
 0x18e   :  { %v1253_v47 = vpop.f32.mrf.mxu0  ;;  %v4186_v48 = vpop.f32.mrf.mxu1 }
 0x18f   :  { %v1254_v57 = vadd.f32 %v1253_v47, %v1213_v37  ;;  %v4722_v37 = vld [vmem:[#allocation7 + $0x128] ss:$12 sps:$4 sm:$0xff]   ;;  %v4734_v47 = vld [vmem:[#allocation8 + $0xac] ss:$12 sps:$4 sm:$0xff]  }
 0x190   :  { %v1255_v49 = vpop.f32.mrf.mxu0  ;;  %v4187_v50 = vpop.f32.mrf.mxu1 }
 0x191   :  { %v4188_v16 = vadd.f32 %v4187_v50, %v4186_v48  ;;  %v4732_v48 = vld [vmem:[#allocation8 + $0xa8] ss:$12 sps:$4 sm:$0xff]   ;;  %v4735_v50 = vld [vmem:[#allocation8 + $0x90] ss:$12 sps:$4 sm:$0xff]  }
 0x192   :  { %v1256_v51 = vpop.f32.mrf.mxu0  ;;  %v4189_v53 = vpop.f32.mrf.mxu1  ;;  %v4737_v49 = vld [vmem:[#allocation8 + $0x94] ss:$12 sps:$4 sm:$0xff]  }
 0x193   :  { %v1374_v22 = vadd.f32 %v4188_v16, %v1334_v15  ;;  %v4740_v51 = vld [vmem:[#allocation8 + $0x7c] ss:$12 sps:$4 sm:$0xff]   ;;  %v4738_v53 = vld [vmem:[#allocation8 + $0x78] ss:$12 sps:$4 sm:$0xff]   ;;  %v4773_v15 = vld [vmem:[#allocation8 + $0xf4] ss:$12 sps:$4 sm:$0xff]  }
 0x194   :  { %v1292_v55 = vpop.f32.mrf.mxu0  ;;  %v4190_v56 = vpop.f32.mrf.mxu1  ;;  %v4790_v16 = vld [vmem:[#allocation8 + $0x1fc] ss:$12 sps:$4 sm:$0xff]  }
 0x195   :  { %v1293_v58 = vadd.f32 %v1292_v55, %v1252_v54  ;;  %v4743_v54 = vld [vmem:[#allocation8 + $0x64] ss:$12 sps:$4 sm:$0xff]   ;;  %v4741_v55 = vld [vmem:[#allocation8 + $0x60] ss:$12 sps:$4 sm:$0xff]  }
 0x196   :  { %v1294_v59 = vpop.f32.mrf.mxu0  ;;  %v1453_v60 = vpop.f32.mrf.mxu1  ;;  %v4746_v56 = vld [vmem:[#allocation8 + $0x4c] ss:$12 sps:$4 sm:$0xff]  }
 0x197   :  { %v1295_v52 = vadd.f32 %v1294_v59, %v1254_v57  ;;  %v1459_v61 = vmax.f32 %v1293_v58, 0.0  ;;  %v4744_v57 = vld [vmem:[#allocation8 + $0x48] ss:$12 sps:$4 sm:$0xff]   ;;  %v4747_v59 = vld [vmem:[#allocation8 + $0x30] ss:$12 sps:$4 sm:$0xff]  }
 0x198   :  { %v1296_v62 = vpop.f32.mrf.mxu0  ;;  %v4344_v63 = vpop.f32.mrf.mxu1  ;;  %v4749_v58 = vld [vmem:[#allocation8 + $0x34] ss:$12 sps:$4 sm:$0xff]  }
 0x199   :  { %v1460_v0 = vmax.f32 %v1295_v52, 0.0  ;;  %v5241_v5 = vpack.c.bf16 %v1459_v61, %v1459_v61  ;;  %v4750_v52 = vld [vmem:[#allocation8 + $0x18] ss:$12 sps:$4 sm:$0xff]   ;;  %v4753_v62 = vld [vmem:[#allocation8] ss:$12 sps:$4 sm:$0xff]  }
 0x19a   :  { %v1297_v1 = vpop.f32.mrf.mxu0  ;;  %v1456_v2 = vpop.f32.mrf.mxu1  ;;  %v4755_v61 = vld [vmem:[#allocation8 + $0x4] ss:$12 sps:$4 sm:$0xff]   ;;  %v4758_v63 = vld [vmem:[#allocation8 + $0x16c] ss:$12 sps:$4 sm:$0xff]  }
 0x19b   :  { %v1463_v3 = vpack.c.bf16 %v1460_v0, %v1460_v0  ;;  %v4756_v0 = vld [vmem:[#allocation8 + $0x168] ss:$12 sps:$4 sm:$0xff]   ;;  %v4759_v2 = vld [vmem:[#allocation8 + $0x150] ss:$12 sps:$4 sm:$0xff]  }
 0x19c   :  { %v4345_v6 = vpop.f32.mrf.mxu1  ;;  %v4761_v1 = vld [vmem:[#allocation8 + $0x154] ss:$12 sps:$4 sm:$0xff]  }
 0x19d   :  { %1994 = vmatprep.mubr.bf16.mxu1 %v1463_v3  ;;  %v4765_v6 = vld [vmem:[#allocation8 + $0x120] ss:$12 sps:$4 sm:$0xff]  }
 0x19e   :  { %1995 = vmatmul.mubr.bf16.vlgmr.msra.gmra.mxu1 %v5241_v5 }
 0x19f   :  { %4347 = vmatpush3.bf16.msra.mxu1 %v4687_v4  ;;  %4362 = vmatprep.mubr.msk.bf16.mxu1 %vm5110_vm0, %v5108_v18  ;;  %v4762_v4 = vld [vmem:[#allocation8 + $0x138] ss:$12 sps:$4 sm:$0xff]  }
 0x1a0   :  { %4348 = vmatprep.subr.bf16.mxu1 %v5108_v18 }
 0x1a3   :  { %4349 = vmatpush3.bf16.msra.mxu1 %v4691_v7  ;;  %v4770_v7 = vld [vmem:[#allocation8 + $0x10c] ss:$12 sps:$4 sm:$0xff]  }
 0x1a4   :  { %4350 = vmatprep.subr.bf16.mxu1 %v5108_v18 }
 0x1a7   :  { %4351 = vmatpush3.bf16.msra.mxu1 %v4695_v8  ;;  %v4780_v8 = vld [vmem:[#allocation8 + $0x228] ss:$12 sps:$4 sm:$0xff]  }
 0x1a8   :  { %4352 = vmatprep.subr.bf16.mxu1 %v5108_v18 }
 0x1ab   :  { %4353 = vmatpush3.bf16.msra.mxu1 %v4699_v9  ;;  %v4782_v9 = vld [vmem:[#allocation8 + $0x22c] ss:$12 sps:$4 sm:$0xff]  }
 0x1ac   :  { %4354 = vmatprep.subr.bf16.mxu1 %v5108_v18 }
 0x1af   :  { %4355 = vmatpush3.bf16.msra.mxu1 %v4703_v12  ;;  %v4786_v12 = vld [vmem:[#allocation8 + $0x214] ss:$12 sps:$4 sm:$0xff]  }
 0x1b0   :  { %4356 = vmatprep.subr.bf16.mxu1 %v5108_v18 }
 0x1b3   :  { %4357 = vmatpush3.bf16.msra.mxu1 %v4707_v14  ;;  %v4784_v14 = vld [vmem:[#allocation8 + $0x210] ss:$12 sps:$4 sm:$0xff]  }
 0x1b4   :  { %v4208_v20 = vpop.f32.mrf.mxu0  ;;  %4358 = vmatprep.subr.bf16.mxu1 %v5108_v18 }
 0x1b6   :  { %v4209_v21 = vpop.f32.mrf.mxu0 }
 0x1b7   :  { %v4210_v23 = vadd.f32 %v4209_v21, %v4208_v20  ;;  %4359 = vmatpush3.bf16.msra.mxu1 %v4711_v17  ;;  %v4771_v17 = vld [vmem:[#allocation8 + $0xf0] ss:$12 sps:$4 sm:$0xff]   ;;  %v4788_v20 = vld [vmem:[#allocation8 + $0x1f8] ss:$12 sps:$4 sm:$0xff]  }
 0x1b8   :  { %v4211_v27 = vpop.f32.mrf.mxu0  ;;  %4360 = vmatprep.subr.bf16.mxu1 %v5108_v18  ;;  %v4776_v21 = vld [vmem:[#allocation8 + $0xdc] ss:$12 sps:$4 sm:$0xff]  }
 0x1b9   :  { %v1414_v26 = vadd.f32 %v4210_v23, %v1374_v22  ;;  %v4794_v22 = vld [vmem:[#allocation8 + $0x1e4] ss:$12 sps:$4 sm:$0xff]  }
 0x1ba   :  { %v4212_v28 = vpop.f32.mrf.mxu0  ;;  %v4774_v23 = vld [vmem:[#allocation8 + $0xd8] ss:$12 sps:$4 sm:$0xff]  }
 0x1bb   :  { %v1454_v29 = vadd.f32 %v1453_v60, %v1414_v26  ;;  %4361 = vmatpush3.bf16.msra.mxu1 %v4715_v24  ;;  %v4752_v60 = vld [vmem:[#allocation8 + $0x1c] ss:$12 sps:$4 sm:$0xff]   ;;  %v4792_v24 = vld [vmem:[#allocation8 + $0x1e0] ss:$12 sps:$4 sm:$0xff]   ;;  %v4779_v27 = vld [vmem:[#allocation8 + $0xc4] ss:$12 sps:$4 sm:$0xff]  }
 0x1bc   :  { %2668 = vmatprep.subr.bf16.mxu1 %v4782_v9  ;;  %v4798_v26 = vld [vmem:[#allocation8 + $0x1cc] ss:$12 sps:$4 sm:$0xff]  }
 0x1bd   :  { %v1461_v30 = vmax.f32 %v1454_v29, 0.0  ;;  %v4777_v28 = vld [vmem:[#allocation8 + $0xc0] ss:$12 sps:$4 sm:$0xff]   ;;  %v4796_v29 = vld [vmem:[#allocation8 + $0x1c8] ss:$12 sps:$4 sm:$0xff]  }
 0x1bf   :  { %v1464_v32 = vpack.c.bf16 %v1461_v30, %v1461_v30  ;;  %v4802_v30 = vld [vmem:[#allocation8 + $0x1b4] ss:$12 sps:$4 sm:$0xff]  }
 0x1c1   :  { %2036 = vmatmul.mubr.bf16.vlgmr.msra.gmra.mxu0 %v1464_v32  ;;  %4363 = vmatmul.mubr.bf16.vlgmr.msra.gmra.mxu1 %v1464_v32  ;;  %v4806_v32 = vld [vmem:[#allocation8 + $0x19c] ss:$12 sps:$4 sm:$0xff]  }
 0x1c2   :  { %4217 = vmatpush3.bf16.msra.mxu0 %v4717_v31  ;;  %2076 = vmatprep.mubr.bf16.mxu0 %v1463_v3  ;;  %v4764_v3 = vld [vmem:[#allocation8 + $0x13c] ss:$12 sps:$4 sm:$0xff]  }
 0x1c3   :  { %4218 = vmatprep.subr.bf16.mxu0 %v4718_v33  ;;  %2700 = vmatprep.mubr.bf16.mxu1 %v5109_v19  ;;  %v4800_v31 = vld [vmem:[#allocation8 + $0x1b0] ss:$12 sps:$4 sm:$0xff]   ;;  %v4804_v33 = vld [vmem:[#allocation8 + $0x198] ss:$12 sps:$4 sm:$0xff]  }
 0x1c4   :  { %2669 = vmatpush1.bf16.msra.mxu1 %v4780_v8 }
 0x1c5   :  { %2670 = vmatprep.subr.bf16.mxu1 %v4786_v12 }
 0x1c6   :  { %4219 = vmatpush3.bf16.msra.mxu0 %v4719_v34  ;;  %v4810_v34 = vld [vmem:[#allocation8 + $0x184] ss:$12 sps:$4 sm:$0xff]  }
 0x1c7   :  { %4220 = vmatprep.subr.bf16.mxu0 %v4720_v35  ;;  %v4808_v35 = vld [vmem:[#allocation8 + $0x180] ss:$12 sps:$4 sm:$0xff]  }
 0x1c8   :  { %2671 = vmatpush1.bf16.msra.mxu1 %v4784_v14 }
 0x1c9   :  { %2672 = vmatprep.subr.bf16.mxu1 %v4790_v16 }
 0x1ca   :  { %4221 = vmatpush3.bf16.msra.mxu0 %v4721_v36  ;;  %v4812_v36 = vld [vmem:[#allocation8 + $0x170] ss:$12 sps:$4 sm:$0xff]  }
 0x1cb   :  { %4222 = vmatprep.subr.bf16.mxu0 %v4722_v37 }
 0x1cc   :  { %2673 = vmatpush1.bf16.msra.mxu1 %v4788_v20  ;;  %v4815_v20 = vld [vmem:[#allocation8 + $0x98] ss:$12 sps:$4 sm:$0xff]  }
 0x1cd   :  { %2674 = vmatprep.subr.bf16.mxu1 %v4794_v22  ;;  %v4817_v22 = vld [vmem:[#allocation8 + $0x80] ss:$12 sps:$4 sm:$0xff]  }
 0x1ce   :  { %4223 = vmatpush3.bf16.msra.mxu0 %v4723_v38 }
 0x1cf   :  { %4224 = vmatprep.subr.bf16.mxu0 %v4724_v39 }
 0x1d0   :  { %2675 = vmatpush1.bf16.msra.mxu1 %v4792_v24  ;;  %v4819_v24 = vld [vmem:[#allocation8 + $0x68] ss:$12 sps:$4 sm:$0xff]  }
 0x1d1   :  { %2676 = vmatprep.subr.bf16.mxu1 %v4798_v26  ;;  %v4821_v26 = vld [vmem:[#allocation8 + $0x50] ss:$12 sps:$4 sm:$0xff]  }
 0x1d2   :  { %4225 = vmatpush3.bf16.msra.mxu0 %v4725_v40 }
 0x1d3   :  { %4226 = vmatprep.subr.bf16.mxu0 %v4726_v41  ;;  %v1561_v41 = vld [vmem:[%s5326_s4] sm:$0x7] }
 0x1d4   :  { %2677 = vmatpush1.bf16.msra.mxu1 %v4796_v29  ;;  %v4823_v29 = vld [vmem:[#allocation8 + $0x38] ss:$12 sps:$4 sm:$0xff]  }
 0x1d5   :  { %2678 = vmatprep.subr.bf16.mxu1 %v4802_v30  ;;  %v4824_v30 = vld [vmem:[#allocation8 + $0xe0] ss:$12 sps:$4 sm:$0xff]  }
 0x1d6   :  { %4227 = vmatpush3.bf16.msra.mxu0 %v4727_v42  ;;  %v1566_v42 = vrot.slane %v1561_v41, %v5228_v25 }
 0x1d7   :  { %4228 = vmatprep.subr.bf16.mxu0 %v4728_v43  ;;  %v1570_v43 = vrot.slane %v1561_v41, %v5235_v10 }
 0x1d8   :  { %2679 = vmatpush1.bf16.msra.mxu1 %v4800_v31  ;;  %v4825_v31 = vld [vmem:[#allocation8 + $0x20] ss:$12 sps:$4 sm:$0xff]  }
 0x1d9   :  { %2680 = vmatprep.subr.bf16.mxu1 %v4806_v32  ;;  %v4827_v32 = vld [vmem:[#allocation8 + $0x8] ss:$12 sps:$4 sm:$0xff]  }
 0x1da   :  { %4229 = vmatpush3.bf16.msra.mxu0 %v4729_v44 }
 0x1db   :  { %4230 = vmatprep.subr.bf16.mxu0 %v4730_v45 }
 0x1dc   :  { %2681 = vmatpush1.bf16.msra.mxu1 %v4804_v33  ;;  %v4830_v33 = vld [vmem:[#allocation10 + $0xac] ss:$12 sps:$4 sm:$0xff]  }
 0x1dd   :  { %2682 = vmatprep.subr.bf16.mxu1 %v4810_v34  ;;  %v4828_v34 = vld [vmem:[#allocation10 + $0xa8] ss:$12 sps:$4 sm:$0xff]  }
 0x1de   :  { %4231 = vmatpush3.bf16.msra.mxu0 %v4731_v46 }
 0x1df   :  { %2627 = vmatprep.subr.bf16.mxu0 %v4734_v47 }
 0x1e0   :  { %2683 = vmatpush1.bf16.msra.mxu1 %v4808_v35  ;;  %v4833_v35 = vld [vmem:[#allocation10 + $0x94] ss:$12 sps:$4 sm:$0xff]  }
 0x1e1   :  { %2077 = vmatmul.mubr.bf16.vlgmr.msra.gmra.mxu0 %v5241_v5  ;;  %v4767_v5 = vld [vmem:[#allocation8 + $0x124] ss:$12 sps:$4 sm:$0xff]   ;;  %4247 = vmatprep.subr.bf16.mxu1 %v4812_v36 }
 0x1e2   :  { %2628 = vmatpush1.bf16.msra.mxu0 %v4732_v48  ;;  %v4831_v36 = vld [vmem:[#allocation10 + $0x90] ss:$12 sps:$4 sm:$0xff]  }
 0x1e3   :  { %2629 = vmatprep.subr.bf16.mxu0 %v4737_v49 }
 0x1e6   :  { %2630 = vmatpush1.bf16.msra.mxu0 %v4735_v50 }
 0x1e7   :  { %2631 = vmatprep.subr.bf16.mxu0 %v4740_v51 }
 0x1ea   :  { %2632 = vmatpush1.bf16.msra.mxu0 %v4738_v53 }
 0x1eb   :  { %2633 = vmatprep.subr.bf16.mxu0 %v4743_v54 }
 0x1ee   :  { %2634 = vmatpush1.bf16.msra.mxu0 %v4741_v55 }
 0x1ef   :  { %2635 = vmatprep.subr.bf16.mxu0 %v4746_v56 }
 0x1f2   :  { %2636 = vmatpush1.bf16.msra.mxu0 %v4744_v57 }
 0x1f3   :  { %2637 = vmatprep.subr.bf16.mxu0 %v4749_v58 }
 0x1f6   :  { %2638 = vmatpush1.bf16.msra.mxu0 %v4747_v59 }
 0x1f7   :  { %2639 = vmatprep.subr.bf16.mxu0 %v4752_v60  ;;  %v4783_v60 = vld [vmem:[#allocation8 + $0x230] ss:$12 sps:$4 sm:$0xff]  }
 0x1fa   :  { %2640 = vmatpush1.bf16.msra.mxu0 %v4750_v52 }
 0x1fb   :  { %2641 = vmatprep.subr.bf16.mxu0 %v4755_v61  ;;  %v4787_v61 = vld [vmem:[#allocation8 + $0x218] ss:$12 sps:$4 sm:$0xff]  }
 0x1fe   :  { %2642 = vmatpush1.bf16.msra.mxu0 %v4753_v62  ;;  %v4791_v62 = vld [vmem:[#allocation8 + $0x200] ss:$12 sps:$4 sm:$0xff]  }
 0x1ff   :  { %2643 = vmatprep.subr.bf16.mxu0 %v4758_v63  ;;  %v4795_v63 = vld [vmem:[#allocation8 + $0x1e8] ss:$12 sps:$4 sm:$0xff]  }
 0x202   :  { %2644 = vmatpush2.bf16.msra.mxu0 %v4756_v0  ;;  %v4799_v0 = vld [vmem:[#allocation8 + $0x1d0] ss:$12 sps:$4 sm:$0xff]  }
 0x203   :  { %2645 = vmatprep.subr.bf16.mxu0 %v4761_v1  ;;  %v4803_v1 = vld [vmem:[#allocation8 + $0x1b8] ss:$12 sps:$4 sm:$0xff]  }
 0x206   :  { %2646 = vmatpush2.bf16.msra.mxu0 %v4759_v2  ;;  %v4807_v2 = vld [vmem:[#allocation8 + $0x1a0] ss:$12 sps:$4 sm:$0xff]  }
 0x207   :  { %2647 = vmatprep.subr.bf16.mxu0 %v4764_v3 }
 0x20a   :  { %2648 = vmatpush2.bf16.msra.mxu0 %v4762_v4  ;;  %v1574_v4 = vrot.slane %v1561_v41, %v5249_v11  ;;  %v4842_v41 = vld [vmem:[#allocation10 + $0x4c] ss:$12 sps:$4 sm:$0xff]  }
 0x20b   :  { %2649 = vmatprep.subr.bf16.mxu0 %v4767_v5 }
 0x20e   :  { %2650 = vmatpush2.bf16.msra.mxu0 %v4765_v6 }
 0x20f   :  { %2651 = vmatprep.subr.bf16.mxu0 %v4770_v7  ;;  %v4811_v7 = vld [vmem:[#allocation8 + $0x188] ss:$12 sps:$4 sm:$0xff]  }
 0x212   :  { %2652 = vmatpush2.bf16.msra.mxu0 %v4768_v13 }
 0x213   :  { %2653 = vmatprep.subr.bf16.mxu0 %v4773_v15  ;;  %v4813_v15 = vld [vmem:[#allocation8 + $0xb0] ss:$12 sps:$4 sm:$0xff]  }
 0x216   :  { %2654 = vmatpush2.bf16.msra.mxu0 %v4771_v17  ;;  %v4814_v17 = vld [vmem:[#allocation8 + $0x158] ss:$12 sps:$4 sm:$0xff]  }
 0x217   :  { %2655 = vmatprep.subr.bf16.mxu0 %v4776_v21  ;;  %v4816_v21 = vld [vmem:[#allocation8 + $0x140] ss:$12 sps:$4 sm:$0xff]  }
 0x21a   :  { %2656 = vmatpush2.bf16.msra.mxu0 %v4774_v23  ;;  %v4818_v23 = vld [vmem:[#allocation8 + $0x128] ss:$12 sps:$4 sm:$0xff]  }
 0x21b   :  { %2657 = vmatprep.subr.bf16.mxu0 %v4779_v27  ;;  %v4820_v27 = vld [vmem:[#allocation8 + $0x110] ss:$12 sps:$4 sm:$0xff]  }
 0x21e   :  { %2658 = vmatpush2.bf16.msra.mxu0 %v4777_v28  ;;  %v4822_v28 = vld [vmem:[#allocation8 + $0xf8] ss:$12 sps:$4 sm:$0xff]  }
 0x21f   :  { %4366 = vmatprep.subr.bf16.mxu0 %v5108_v18 }
 0x25e   :  { %v1996_v37 = vpop.f32.mrf.mxu1 }
 0x25f   :  { %v1997_v44 = vadd.f32 %v1996_v37, %v1566_v42  ;;  %v4836_v37 = vld [vmem:[#allocation10 + $0x7c] ss:$12 sps:$4 sm:$0xff]  }
 0x260   :  { %v1998_v38 = vpop.f32.mrf.mxu1  ;;  %v4840_v42 = vld [vmem:[#allocation10 + $0x48] ss:$12 sps:$4 sm:$0xff]  }
 0x261   :  { %v1999_v47 = vadd.f32 %v1998_v38, %v1570_v43  ;;  %v4834_v38 = vld [vmem:[#allocation10 + $0x78] ss:$12 sps:$4 sm:$0xff]   ;;  %v4845_v43 = vld [vmem:[#allocation10 + $0x34] ss:$12 sps:$4 sm:$0xff]  }
 0x262   :  { %v2000_v39 = vpop.f32.mrf.mxu1 }
 0x263   :  { %v4839_v39 = vld [vmem:[#allocation10 + $0x64] ss:$12 sps:$4 sm:$0xff]  }
 0x264   :  { %v2001_v40 = vpop.f32.mrf.mxu1 }
 0x265   :  { %v4837_v40 = vld [vmem:[#allocation10 + $0x60] ss:$12 sps:$4 sm:$0xff]  }
 0x281   :  { %v2037_v45 = vpop.f32.mrf.mxu0  ;;  %v2118_v46 = vpop.f32.mrf.mxu1 }
 0x282   :  { %v2038_v48 = vadd.f32 %v2037_v45, %v1997_v44  ;;  %v4843_v44 = vld [vmem:[#allocation10 + $0x30] ss:$12 sps:$4 sm:$0xff]  }
 0x283   :  { %v2039_v49 = vpop.f32.mrf.mxu0  ;;  %v4364_v50 = vpop.f32.mrf.mxu1  ;;  %v4848_v45 = vld [vmem:[#allocation10 + $0x1c] ss:$12 sps:$4 sm:$0xff]  }
 0x284   :  { %v2040_v51 = vadd.f32 %v2039_v49, %v1999_v47  ;;  %v2124_v53 = vmax.f32 %v2038_v48, 0.0  ;;  %v4851_v47 = vld [vmem:[#allocation10 + $0x4] ss:$12 sps:$4 sm:$0xff]   ;;  %v4849_v48 = vld [vmem:[#allocation10] ss:$12 sps:$4 sm:$0xff]  }
 0x285   :  { %v2041_v54 = vpop.f32.mrf.mxu0  ;;  %v2121_v55 = vpop.f32.mrf.mxu1  ;;  %v4854_v49 = vld [vmem:[#allocation10 + $0x16c] ss:$12 sps:$4 sm:$0xff]   ;;  %v4852_v50 = vld [vmem:[#allocation10 + $0x168] ss:$12 sps:$4 sm:$0xff]  }
 0x286   :  { %v2125_v56 = vmax.f32 %v2040_v51, 0.0  ;;  %v5265_v52 = vpack.c.bf16 %v2124_v53, %v2124_v53  ;;  %v4857_v51 = vld [vmem:[#allocation10 + $0x154] ss:$12 sps:$4 sm:$0xff]   ;;  %v4855_v53 = vld [vmem:[#allocation10 + $0x150] ss:$12 sps:$4 sm:$0xff]  }
 0x287   :  { %v2042_v57 = vpop.f32.mrf.mxu0  ;;  %v4365_v58 = vpop.f32.mrf.mxu1  ;;  %v4860_v54 = vld [vmem:[#allocation10 + $0x13c] ss:$12 sps:$4 sm:$0xff]   ;;  %v4858_v55 = vld [vmem:[#allocation10 + $0x138] ss:$12 sps:$4 sm:$0xff]  }
 0x288   :  { %v2128_v59 = vpack.c.bf16 %v2125_v56, %v2125_v56  ;;  %v4863_v56 = vld [vmem:[#allocation10 + $0x124] ss:$12 sps:$4 sm:$0xff]   ;;  %v4861_v57 = vld [vmem:[#allocation10 + $0x120] ss:$12 sps:$4 sm:$0xff]  }
 0x289   :  { %v4866_v58 = vld [vmem:[#allocation10 + $0x10c] ss:$12 sps:$4 sm:$0xff]  }
 0x28a   :  { %2659 = vmatprep.mubr.bf16.mxu0 %v2128_v59 }
 0x28b   :  { %2660 = vmatmul.mubr.bf16.vlgmr.msra.gmra.mxu0 %v5265_v52 }
 0x28c   :  { %4367 = vmatpush3.bf16.msra.mxu0 %v4783_v60  ;;  %4382 = vmatprep.mubr.msk.bf16.mxu0 %vm5110_vm0, %v5108_v18  ;;  %v4878_v60 = vld [vmem:[#allocation10 + $0x22c] ss:$12 sps:$4 sm:$0xff]  }
 0x28d   :  { %4368 = vmatprep.subr.bf16.mxu0 %v5108_v18 }
 0x290   :  { %4369 = vmatpush3.bf16.msra.mxu0 %v4787_v61  ;;  %v4864_v61 = vld [vmem:[#allocation10 + $0x108] ss:$12 sps:$4 sm:$0xff]  }
 0x291   :  { %4370 = vmatprep.subr.bf16.mxu0 %v5108_v18 }
 0x294   :  { %4371 = vmatpush3.bf16.msra.mxu0 %v4791_v62  ;;  %v4880_v62 = vld [vmem:[#allocation10 + $0x210] ss:$12 sps:$4 sm:$0xff]  }
 0x295   :  { %4372 = vmatprep.subr.bf16.mxu0 %v5108_v18 }
 0x298   :  { %4373 = vmatpush3.bf16.msra.mxu0 %v4795_v63  ;;  %v4869_v63 = vld [vmem:[#allocation10 + $0xf4] ss:$12 sps:$4 sm:$0xff]  }
 0x299   :  { %4374 = vmatprep.subr.bf16.mxu0 %v5108_v18 }
 0x29c   :  { %4375 = vmatpush3.bf16.msra.mxu0 %v4799_v0  ;;  %v4886_v0 = vld [vmem:[#allocation10 + $0x1fc] ss:$12 sps:$4 sm:$0xff]  }
 0x29d   :  { %4376 = vmatprep.subr.bf16.mxu0 %v5108_v18 }
 0x2a0   :  { %4377 = vmatpush3.bf16.msra.mxu0 %v4803_v1  ;;  %v4867_v1 = vld [vmem:[#allocation10 + $0xf0] ss:$12 sps:$4 sm:$0xff]  }
 0x2a1   :  { %v4232_v3 = vpop.f32.mrf.mxu0  ;;  %4378 = vmatprep.subr.bf16.mxu0 %v5108_v18 }
 0x2a3   :  { %v4233_v5 = vpop.f32.mrf.mxu0 }
 0x2a4   :  { %v4234_v6 = vadd.f32 %v4233_v5, %v4232_v3  ;;  %4379 = vmatpush3.bf16.msra.mxu0 %v4807_v2  ;;  %v4884_v2 = vld [vmem:[#allocation10 + $0x1f8] ss:$12 sps:$4 sm:$0xff]   ;;  %v4872_v3 = vld [vmem:[#allocation10 + $0xdc] ss:$12 sps:$4 sm:$0xff]  }
 0x2a5   :  { %v4235_v8 = vpop.f32.mrf.mxu0  ;;  %4380 = vmatprep.subr.bf16.mxu0 %v5108_v18  ;;  %v4870_v5 = vld [vmem:[#allocation10 + $0xd8] ss:$12 sps:$4 sm:$0xff]  }
 0x2a6   :  { %v2079_v9 = vadd.f32 %v4234_v6, %v1574_v4  ;;  %v4890_v4 = vld [vmem:[#allocation10 + $0x1e4] ss:$12 sps:$4 sm:$0xff]   ;;  %v4888_v6 = vld [vmem:[#allocation10 + $0x1e0] ss:$12 sps:$4 sm:$0xff]  }
 0x2a7   :  { %v4236_v12 = vpop.f32.mrf.mxu0  ;;  %v4894_v8 = vld [vmem:[#allocation10 + $0x1cc] ss:$12 sps:$4 sm:$0xff]  }
 0x2a8   :  { %v2119_v13 = vadd.f32 %v2118_v46, %v2079_v9  ;;  %4381 = vmatpush3.bf16.msra.mxu0 %v4811_v7  ;;  %v4846_v46 = vld [vmem:[#allocation10 + $0x18] ss:$12 sps:$4 sm:$0xff]   ;;  %v4873_v9 = vld [vmem:[#allocation10 + $0xc0] ss:$12 sps:$4 sm:$0xff]   ;;  %v4892_v12 = vld [vmem:[#allocation10 + $0x1c8] ss:$12 sps:$4 sm:$0xff]  }
 0x2a9   :  { %3333 = vmatprep.subr.bf16.mxu0 %v4878_v60  ;;  %v4875_v7 = vld [vmem:[#allocation10 + $0xc4] ss:$12 sps:$4 sm:$0xff]  }
 0x2aa   :  { %v2126_v14 = vmax.f32 %v2119_v13, 0.0  ;;  %v4898_v13 = vld [vmem:[#allocation10 + $0x1b4] ss:$12 sps:$4 sm:$0xff]  }
 0x2ac   :  { %v2129_v16 = vpack.c.bf16 %v2126_v14, %v2126_v14  ;;  %v4896_v14 = vld [vmem:[#allocation10 + $0x1b0] ss:$12 sps:$4 sm:$0xff]  }
 0x2ae   :  { %2701 = vmatmul.mubr.bf16.vlgmr.msra.gmra.mxu1 %v2129_v16  ;;  %4383 = vmatmul.mubr.bf16.vlgmr.msra.gmra.mxu0 %v2129_v16  ;;  %v4900_v16 = vld [vmem:[#allocation10 + $0x198] ss:$12 sps:$4 sm:$0xff]  }
 0x2af   :  { %4248 = vmatpush3.bf16.msra.mxu1 %v4813_v15  ;;  %2741 = vmatprep.mubr.bf16.mxu1 %v2128_v59  ;;  %v4876_v59 = vld [vmem:[#allocation10 + $0x228] ss:$12 sps:$4 sm:$0xff]  }
 0x2b0   :  { %4249 = vmatprep.subr.bf16.mxu1 %v4814_v17  ;;  %3365 = vmatprep.mubr.bf16.mxu0 %v5109_v19  ;;  %v4826_v19 = vld [vmem:[#allocation8 + $0xc8] ss:$12 sps:$4 sm:$0xff]   ;;  %v4906_v17 = vld [vmem:[#allocation10 + $0x184] ss:$12 sps:$4 sm:$0xff]  }
 0x2b1   :  { %3334 = vmatpush1.bf16.msra.mxu0 %v4876_v59  ;;  %v4902_v15 = vld [vmem:[#allocation10 + $0x19c] ss:$12 sps:$4 sm:$0xff]  }
 0x2b3   :  { %4250 = vmatpush3.bf16.msra.mxu1 %v4815_v20  ;;  %v4904_v20 = vld [vmem:[#allocation10 + $0x180] ss:$12 sps:$4 sm:$0xff]  }
 0x2b4   :  { %4251 = vmatprep.subr.bf16.mxu1 %v4816_v21  ;;  %v4908_v21 = vld [vmem:[#allocation10 + $0x170] ss:$12 sps:$4 sm:$0xff]  }
 0x2b7   :  { %4252 = vmatpush3.bf16.msra.mxu1 %v4817_v22 }
 0x2b8   :  { %4253 = vmatprep.subr.bf16.mxu1 %v4818_v23 }
 0x2bb   :  { %4254 = vmatpush3.bf16.msra.mxu1 %v4819_v24 }
 0x2bc   :  { %4255 = vmatprep.subr.bf16.mxu1 %v4820_v27 }
 0x2bf   :  { %4256 = vmatpush3.bf16.msra.mxu1 %v4821_v26  ;;  %v2226_v26 = vld [vmem:[%s5328_s6] sm:$0x7] }
 0x2c0   :  { %4257 = vmatprep.subr.bf16.mxu1 %v4822_v28  ;;  %v2231_v28 = vrot.slane %v2226_v26, %v5228_v25 }
 0x2c3   :  { %4258 = vmatpush3.bf16.msra.mxu1 %v4823_v29  ;;  %v2235_v29 = vrot.slane %v2226_v26, %v5235_v10 }
 0x2c4   :  { %4259 = vmatprep.subr.bf16.mxu1 %v4824_v30 }
 0x2c7   :  { %4260 = vmatpush3.bf16.msra.mxu1 %v4825_v31 }
 0x2c8   :  { %4261 = vmatprep.subr.bf16.mxu1 %v4826_v19 }
 0x2cb   :  { %4262 = vmatpush3.bf16.msra.mxu1 %v4827_v32 }
 0x2cc   :  { %3292 = vmatprep.subr.bf16.mxu1 %v4830_v33 }
 0x2ce   :  { %2742 = vmatmul.mubr.bf16.vlgmr.msra.gmra.mxu1 %v5265_v52  ;;  %v4882_v52 = vld [vmem:[#allocation10 + $0x214] ss:$12 sps:$4 sm:$0xff]  }
 0x2cf   :  { %3293 = vmatpush1.bf16.msra.mxu1 %v4828_v34  ;;  %3335 = vmatprep.subr.bf16.mxu0 %v4882_v52 }
 0x2d0   :  { %3294 = vmatprep.subr.bf16.mxu1 %v4833_v35  ;;  %3336 = vmatpush1.bf16.msra.mxu0 %v4880_v62  ;;  %v4909_v62 = vld [vmem:[#allocation10 + $0xb0] ss:$12 sps:$4 sm:$0xff]  }
 0x2d1   :  { %3337 = vmatprep.subr.bf16.mxu0 %v4886_v0  ;;  %v4910_v0 = vld [vmem:[#allocation10 + $0x158] ss:$12 sps:$4 sm:$0xff]  }
 0x2d3   :  { %3295 = vmatpush1.bf16.msra.mxu1 %v4831_v36 }
 0x2d4   :  { %3296 = vmatprep.subr.bf16.mxu1 %v4836_v37  ;;  %3338 = vmatpush1.bf16.msra.mxu0 %v4884_v2  ;;  %v4912_v2 = vld [vmem:[#allocation10 + $0x140] ss:$12 sps:$4 sm:$0xff]  }
 0x2d5   :  { %3339 = vmatprep.subr.bf16.mxu0 %v4890_v4  ;;  %v4914_v4 = vld [vmem:[#allocation10 + $0x128] ss:$12 sps:$4 sm:$0xff]  }
 0x2d7   :  { %3297 = vmatpush1.bf16.msra.mxu1 %v4834_v38 }
 0x2d8   :  { %3298 = vmatprep.subr.bf16.mxu1 %v4839_v39  ;;  %3340 = vmatpush1.bf16.msra.mxu0 %v4888_v6  ;;  %v4916_v6 = vld [vmem:[#allocation10 + $0x110] ss:$12 sps:$4 sm:$0xff]  }
 0x2d9   :  { %3341 = vmatprep.subr.bf16.mxu0 %v4894_v8  ;;  %v4918_v8 = vld [vmem:[#allocation10 + $0xf8] ss:$12 sps:$4 sm:$0xff]  }
 0x2db   :  { %3299 = vmatpush1.bf16.msra.mxu1 %v4837_v40 }
 0x2dc   :  { %3300 = vmatprep.subr.bf16.mxu1 %v4842_v41  ;;  %3342 = vmatpush1.bf16.msra.mxu0 %v4892_v12  ;;  %v4920_v12 = vld [vmem:[#allocation10 + $0xe0] ss:$12 sps:$4 sm:$0xff]  }
 0x2dd   :  { %3343 = vmatprep.subr.bf16.mxu0 %v4898_v13  ;;  %v4921_v13 = vld [vmem:[#allocation10 + $0x20] ss:$12 sps:$4 sm:$0xff]  }
 0x2df   :  { %3301 = vmatpush1.bf16.msra.mxu1 %v4840_v42 }
 0x2e0   :  { %3302 = vmatprep.subr.bf16.mxu1 %v4845_v43  ;;  %3344 = vmatpush1.bf16.msra.mxu0 %v4896_v14  ;;  %v4922_v14 = vld [vmem:[#allocation10 + $0xc8] ss:$12 sps:$4 sm:$0xff]  }
 0x2e1   :  { %3345 = vmatprep.subr.bf16.mxu0 %v4902_v15  ;;  %v4923_v15 = vld [vmem:[#allocation10 + $0x8] ss:$12 sps:$4 sm:$0xff]  }
 0x2e3   :  { %3303 = vmatpush1.bf16.msra.mxu1 %v4843_v44  ;;  %v4879_v44 = vld [vmem:[#allocation10 + $0x230] ss:$12 sps:$4 sm:$0xff]  }
 0x2e4   :  { %3304 = vmatprep.subr.bf16.mxu1 %v4848_v45  ;;  %3346 = vmatpush1.bf16.msra.mxu0 %v4900_v16  ;;  %v4924_v16 = vld [vmem:[#allocation11 + $0x78] sm:$0xff]  }
 0x2e5   :  { %3347 = vmatprep.subr.bf16.mxu0 %v4906_v17  ;;  %v4925_v17 = vld [vmem:[#allocation11 + $0x38] sm:$0xff]  }
 0x2e7   :  { %3305 = vmatpush1.bf16.msra.mxu1 %v4846_v46  ;;  %v4883_v46 = vld [vmem:[#allocation10 + $0x218] ss:$12 sps:$4 sm:$0xff]  }
 0x2e8   :  { %3306 = vmatprep.subr.bf16.mxu1 %v4851_v47  ;;  %3348 = vmatpush1.bf16.msra.mxu0 %v4904_v20  ;;  %v4887_v47 = vld [vmem:[#allocation10 + $0x200] ss:$12 sps:$4 sm:$0xff]   ;;  %v4926_v20 = vld [vmem:[#allocation11 + $0x70] sm:$0xff]  }
 0x2e9   :  { %4278 = vmatprep.subr.bf16.mxu0 %v4908_v21  ;;  %v4927_v21 = vld [vmem:[#allocation11 + $0x30] sm:$0xff]  }
 0x2eb   :  { %3307 = vmatpush1.bf16.msra.mxu1 %v4849_v48  ;;  %v4891_v48 = vld [vmem:[#allocation10 + $0x1e8] ss:$12 sps:$4 sm:$0xff]  }
 0x2ec   :  { %3308 = vmatprep.subr.bf16.mxu1 %v4854_v49  ;;  %v4895_v49 = vld [vmem:[#allocation10 + $0x1d0] ss:$12 sps:$4 sm:$0xff]  }
 0x2ef   :  { %3309 = vmatpush2.bf16.msra.mxu1 %v4852_v50  ;;  %v4899_v50 = vld [vmem:[#allocation10 + $0x1b8] ss:$12 sps:$4 sm:$0xff]  }
 0x2f0   :  { %3310 = vmatprep.subr.bf16.mxu1 %v4857_v51  ;;  %v4903_v51 = vld [vmem:[#allocation10 + $0x1a0] ss:$12 sps:$4 sm:$0xff]  }
 0x2f3   :  { %3311 = vmatpush2.bf16.msra.mxu1 %v4855_v53 }
 0x2f4   :  { %3312 = vmatprep.subr.bf16.mxu1 %v4860_v54  ;;  %v2239_v54 = vrot.slane %v2226_v26, %v5249_v11  ;;  %v4932_v26 = vld [vmem:[#allocation11 + $0x58] sm:$0xff]  }
 0x2f7   :  { %3313 = vmatpush2.bf16.msra.mxu1 %v4858_v55 }
 0x2f8   :  { %3314 = vmatprep.subr.bf16.mxu1 %v4863_v56 }
 0x2fb   :  { %3315 = vmatpush2.bf16.msra.mxu1 %v4861_v57  ;;  %v4907_v57 = vld [vmem:[#allocation10 + $0x188] ss:$12 sps:$4 sm:$0xff]  }
 0x2fc   :  { %3316 = vmatprep.subr.bf16.mxu1 %v4866_v58 }
 0x2ff   :  { %3317 = vmatpush2.bf16.msra.mxu1 %v4864_v61 }
 0x300   :  { %3318 = vmatprep.subr.bf16.mxu1 %v4869_v63 }
 0x303   :  { %3319 = vmatpush2.bf16.msra.mxu1 %v4867_v1  ;;  %v4911_v1 = vld [vmem:[#allocation10 + $0x98] ss:$12 sps:$4 sm:$0xff]  }
 0x304   :  { %3320 = vmatprep.subr.bf16.mxu1 %v4872_v3  ;;  %v4913_v3 = vld [vmem:[#allocation10 + $0x80] ss:$12 sps:$4 sm:$0xff]  }
 0x307   :  { %3321 = vmatpush2.bf16.msra.mxu1 %v4870_v5  ;;  %v4915_v5 = vld [vmem:[#allocation10 + $0x68] ss:$12 sps:$4 sm:$0xff]  }
 0x308   :  { %3322 = vmatprep.subr.bf16.mxu1 %v4875_v7  ;;  %v4917_v7 = vld [vmem:[#allocation10 + $0x50] ss:$12 sps:$4 sm:$0xff]  }
 0x30b   :  { %3323 = vmatpush2.bf16.msra.mxu1 %v4873_v9  ;;  %v4919_v9 = vld [vmem:[#allocation10 + $0x38] ss:$12 sps:$4 sm:$0xff]  }
 0x30c   :  { %4386 = vmatprep.subr.bf16.mxu1 %v5108_v18 }
 0x34b   :  { %v2661_v22 = vpop.f32.mrf.mxu0 }
 0x34c   :  { %v2662_v30 = vadd.f32 %v2661_v22, %v2231_v28  ;;  %v4928_v22 = vld [vmem:[#allocation11 + $0x68] sm:$0xff]   ;;  %v4933_v28 = vld [vmem:[#allocation11 + $0x18] sm:$0xff]  }
 0x34d   :  { %v2663_v23 = vpop.f32.mrf.mxu0 }
 0x34e   :  { %v2664_v32 = vadd.f32 %v2663_v23, %v2235_v29  ;;  %v4929_v23 = vld [vmem:[#allocation11 + $0x28] sm:$0xff]   ;;  %v4934_v29 = vld [vmem:[#allocation11 + $0x50] sm:$0xff]  }
 0x34f   :  { %v2665_v24 = vpop.f32.mrf.mxu0 }
 0x350   :  { %v4930_v24 = vld [vmem:[#allocation11 + $0x60] sm:$0xff]  }
 0x351   :  { %v2666_v27 = vpop.f32.mrf.mxu0 }
 0x352   :  { %v4931_v27 = vld [vmem:[#allocation11 + $0x20] sm:$0xff]  }
 0x36e   :  { %v2702_v31 = vpop.f32.mrf.mxu1  ;;  %v2783_v19 = vpop.f32.mrf.mxu0 }
 0x36f   :  { %v2703_v33 = vadd.f32 %v2702_v31, %v2662_v30  ;;  %v4935_v30 = vld [vmem:[#allocation11 + $0x10] sm:$0xff]   ;;  %v4936_v31 = vld [vmem:[#allocation11 + $0x48] sm:$0xff]  }
 0x370   :  { %v2704_v34 = vpop.f32.mrf.mxu1  ;;  %v4384_v35 = vpop.f32.mrf.mxu0 }
 0x371   :  { %v2705_v36 = vadd.f32 %v2704_v34, %v2664_v32  ;;  %v2789_v37 = vmax.f32 %v2703_v33, 0.0  ;;  %v4938_v32 = vld [vmem:[#allocation11 + $0x40] sm:$0xff]   ;;  %v4940_v34 = vld [vmem:[#allocation11 + $0xb8] sm:$0xff]   ;;  %v4941_v35 = vld [vmem:[#allocation11 + $0xb0] sm:$0xff]  }
 0x372   :  { %v2706_v38 = vpop.f32.mrf.mxu1  ;;  %v2786_v39 = vpop.f32.mrf.mxu0  ;;  %v4939_v33 = vld [vmem:[#allocation11] sm:$0xff]  }
 0x373   :  { %v2790_v40 = vmax.f32 %v2705_v36, 0.0  ;;  %v5286_v45 = vpack.c.bf16 %v2789_v37, %v2789_v37  ;;  %v4942_v36 = vld [vmem:[#allocation11 + $0xa8] sm:$0xff]   ;;  %v4943_v37 = vld [vmem:[#allocation11 + $0xa0] sm:$0xff]   ;;  %v4944_v38 = vld [vmem:[#allocation11 + $0x98] sm:$0xff]  }
 0x374   :  { %v2707_v41 = vpop.f32.mrf.mxu1  ;;  %v4385_v42 = vpop.f32.mrf.mxu0  ;;  %v4945_v39 = vld [vmem:[#allocation11 + $0x90] sm:$0xff]  }
 0x375   :  { %v2793_v43 = vpack.c.bf16 %v2790_v40, %v2790_v40  ;;  %v4946_v40 = vld [vmem:[#allocation11 + $0x88] sm:$0xff]   ;;  %v4947_v41 = vld [vmem:[#allocation11 + $0x80] sm:$0xff]  }
 0x377   :  { %3324 = vmatprep.mubr.bf16.mxu1 %v2793_v43 }
 0x378   :  { %3325 = vmatmul.mubr.bf16.vlgmr.msra.gmra.mxu1 %v5286_v45 }
 0x379   :  { %4387 = vmatpush3.bf16.msra.mxu1 %v4879_v44  ;;  %4402 = vmatprep.mubr.msk.bf16.mxu1 %vm5110_vm0, %v5108_v18 }
 0x37a   :  { %4388 = vmatprep.subr.bf16.mxu1 %v5108_v18 }
 0x37d   :  { %4389 = vmatpush3.bf16.msra.mxu1 %v4883_v46  ;;  %v2891_v46 = vld [vmem:[%s5330_s8] sm:$0x7] }
 0x37e   :  { %4390 = vmatprep.subr.bf16.mxu1 %v5108_v18 }
 0x381   :  { %4391 = vmatpush3.bf16.msra.mxu1 %v4887_v47  ;;  %v2896_v47 = vrot.slane %v2891_v46, %v5228_v25 }
 0x382   :  { %4392 = vmatprep.subr.bf16.mxu1 %v5108_v18 }
 0x385   :  { %4393 = vmatpush3.bf16.msra.mxu1 %v4891_v48  ;;  %v2900_v48 = vrot.slane %v2891_v46, %v5235_v10  ;;  %v2904_v10 = vrot.slane %v2891_v46, %v5249_v11 }
 0x386   :  { %4394 = vmatprep.subr.bf16.mxu1 %v5108_v18 }
 0x389   :  { %4395 = vmatpush3.bf16.msra.mxu1 %v4895_v49 }
 0x38a   :  { %4396 = vmatprep.subr.bf16.mxu1 %v5108_v18 }
 0x38d   :  { %4397 = vmatpush3.bf16.msra.mxu1 %v4899_v50 }
 0x38e   :  { %v4263_v53 = vpop.f32.mrf.mxu1  ;;  %4398 = vmatprep.subr.bf16.mxu1 %v5108_v18 }
 0x390   :  { %v4264_v55 = vpop.f32.mrf.mxu1 }
 0x391   :  { %v4265_v56 = vadd.f32 %v4264_v55, %v4263_v53  ;;  %4399 = vmatpush3.bf16.msra.mxu1 %v4903_v51 }
 0x392   :  { %v4266_v58 = vpop.f32.mrf.mxu1  ;;  %4400 = vmatprep.subr.bf16.mxu1 %v5108_v18 }
 0x393   :  { %v2744_v59 = vadd.f32 %v4265_v56, %v2239_v54 }
 0x394   :  { %v4267_v60 = vpop.f32.mrf.mxu1 }
 0x395   :  { %v2784_v52 = vadd.f32 %v2783_v19, %v2744_v59  ;;  %4401 = vmatpush3.bf16.msra.mxu1 %v4907_v57  ;;  %v4937_v19 = vld [vmem:[#allocation11 + $0x8] sm:$0xff]  }
 0x396   :  { %4406 = vmatprep.subr.bf16.mxu1 %v5108_v18 }
 0x397   :  { %v2791_v61 = vmax.f32 %v2784_v52, 0.0 }
 0x399   :  { %v2794_v63 = vpack.c.bf16 %v2791_v61, %v2791_v61 }
 0x39b   :  { %3366 = vmatmul.mubr.bf16.vlgmr.msra.gmra.mxu0 %v2794_v63  ;;  %4403 = vmatmul.mubr.bf16.vlgmr.msra.gmra.mxu1 %v2794_v63 }
 0x39c   :  { %4279 = vmatpush3.bf16.msra.mxu0 %v4909_v62  ;;  %3406 = vmatprep.mubr.bf16.mxu0 %v2793_v43 }
 0x39d   :  { %4280 = vmatprep.subr.bf16.mxu0 %v4910_v0  ;;  %4422 = vmatprep.mubr.msk.bf16.mxu1 %vm5110_vm0, %v5108_v18 }
 0x39e   :  { %4407 = vmatpush3.bf16.msra.mxu1 %v4940_v34 }
 0x39f   :  { %4408 = vmatprep.subr.bf16.mxu1 %v5108_v18 }
 0x3a0   :  { %4281 = vmatpush3.bf16.msra.mxu0 %v4911_v1 }
 0x3a1   :  { %4282 = vmatprep.subr.bf16.mxu0 %v4912_v2 }
 0x3a2   :  { %4409 = vmatpush3.bf16.msra.mxu1 %v4941_v35 }
 0x3a3   :  { %4410 = vmatprep.subr.bf16.mxu1 %v5108_v18 }
 0x3a4   :  { %4283 = vmatpush3.bf16.msra.mxu0 %v4913_v3 }
 0x3a5   :  { %4284 = vmatprep.subr.bf16.mxu0 %v4914_v4 }
 0x3a6   :  { %4411 = vmatpush3.bf16.msra.mxu1 %v4942_v36 }
 0x3a7   :  { %4412 = vmatprep.subr.bf16.mxu1 %v5108_v18 }
 0x3a8   :  { %4285 = vmatpush3.bf16.msra.mxu0 %v4915_v5 }
 0x3a9   :  { %4286 = vmatprep.subr.bf16.mxu0 %v4916_v6 }
 0x3aa   :  { %4413 = vmatpush3.bf16.msra.mxu1 %v4943_v37 }
 0x3ab   :  { %4414 = vmatprep.subr.bf16.mxu1 %v5108_v18 }
 0x3ac   :  { %4287 = vmatpush3.bf16.msra.mxu0 %v4917_v7 }
 0x3ad   :  { %4288 = vmatprep.subr.bf16.mxu0 %v4918_v8 }
 0x3ae   :  { %4415 = vmatpush3.bf16.msra.mxu1 %v4944_v38 }
 0x3af   :  { %4416 = vmatprep.subr.bf16.mxu1 %v5108_v18 }
 0x3b0   :  { %4289 = vmatpush3.bf16.msra.mxu0 %v4919_v9 }
 0x3b1   :  { %4290 = vmatprep.subr.bf16.mxu0 %v4920_v12 }
 0x3b2   :  { %4417 = vmatpush3.bf16.msra.mxu1 %v4945_v39 }
 0x3b3   :  { %4418 = vmatprep.subr.bf16.mxu1 %v5108_v18 }
 0x3b4   :  { %4291 = vmatpush3.bf16.msra.mxu0 %v4921_v13 }
 0x3b5   :  { %4292 = vmatprep.subr.bf16.mxu0 %v4922_v14 }
 0x3b6   :  { %4419 = vmatpush3.bf16.msra.mxu1 %v4946_v40 }
 0x3b7   :  { %4420 = vmatprep.subr.bf16.mxu1 %v5108_v18 }
 0x3b8   :  { %4293 = vmatpush3.bf16.msra.mxu0 %v4923_v15  ;;  %v4123_v15 = vld [vmem:[%s5332_s10] ss:$0 sm:$0xff] }
 0x3b9   :  { %4309 = vmatprep.subr.bf16.mxu0 %v4924_v16 }
 0x3ba   :  { %4421 = vmatpush3.bf16.msra.mxu1 %v4947_v41 }
 0x3bb   :  { %3407 = vmatmul.mubr.bf16.vlgmr.msra.gmra.mxu0 %v5286_v45 }
 0x3bc   :  { %4310 = vmatpush3.bf16.msra.mxu0 %v4925_v17 }
 0x3bd   :  { %4311 = vmatprep.subr.bf16.mxu0 %v4926_v20 }
 0x3c0   :  { %4312 = vmatpush3.bf16.msra.mxu0 %v4927_v21 }
 0x3c1   :  { %4313 = vmatprep.subr.bf16.mxu0 %v4928_v22 }
 0x3c4   :  { %4314 = vmatpush3.bf16.msra.mxu0 %v4929_v23 }
 0x3c5   :  { %4315 = vmatprep.subr.bf16.mxu0 %v4930_v24 }
 0x3c8   :  { %4316 = vmatpush3.bf16.msra.mxu0 %v4931_v27 }
 0x3c9   :  { %4317 = vmatprep.subr.bf16.mxu0 %v4932_v26 }
 0x3cc   :  { %4318 = vmatpush3.bf16.msra.mxu0 %v4933_v28 }
 0x3cd   :  { %4319 = vmatprep.subr.bf16.mxu0 %v4934_v29 }
 0x3d0   :  { %4320 = vmatpush3.bf16.msra.mxu0 %v4935_v30 }
 0x3d1   :  { %4321 = vmatprep.subr.bf16.mxu0 %v4936_v31 }
 0x3d4   :  { %4322 = vmatpush3.bf16.msra.mxu0 %v4937_v19 }
 0x3d5   :  { %4323 = vmatprep.subr.bf16.mxu0 %v4938_v32 }
 0x3d8   :  { %4324 = vmatpush3.bf16.msra.mxu0 %v4939_v33 }
 0x438   :  { %v3326_v42 = vpop.f32.mrf.mxu1 }
 0x439   :  { %v3327_v49 = vadd.f32 %v3326_v42, %v2896_v47 }
 0x43a   :  { %v3328_v43 = vpop.f32.mrf.mxu1 }
 0x43b   :  { %v3329_v53 = vadd.f32 %v3328_v43, %v2900_v48 }
 0x43c   :  { %v3330_v44 = vpop.f32.mrf.mxu1 }
 0x43e   :  { %v3331_v45 = vpop.f32.mrf.mxu1 }
 0x45b   :  { %v3367_v50 = vpop.f32.mrf.mxu0  ;;  %v3448_v51 = vpop.f32.mrf.mxu1 }
 0x45c   :  { %v3368_v54 = vadd.f32 %v3367_v50, %v3327_v49 }
 0x45d   :  { %v3369_v18 = vpop.f32.mrf.mxu0  ;;  %v4404_v55 = vpop.f32.mrf.mxu1 }
 0x45e   :  { %v3370_v56 = vadd.f32 %v3369_v18, %v3329_v53  ;;  %v3454_v57 = vmax.f32 %v3368_v54, 0.0 }
 0x45f   :  { %v3371_v58 = vpop.f32.mrf.mxu0  ;;  %v3451_v59 = vpop.f32.mrf.mxu1 }
 0x460   :  { %v3455_v60 = vmax.f32 %v3370_v56, 0.0  ;;  %v3457_v63 = vpack.c.bf16 %v3454_v57, %v3454_v57 }
 0x461   :  { %v3372_v52 = vpop.f32.mrf.mxu0  ;;  %v4405_v61 = vpop.f32.mrf.mxu1 }
 0x462   :  { %v3458_v62 = vpack.c.bf16 %v3455_v60, %v3455_v60 }
 0x464   :  { %3691 = vmatprep.mubr.bf16.mxu0 %v3458_v62 }
 0x465   :  { %3692 = vmatmul.mubr.bf16.vlgmr.msra.gmra.mxu0 %v3457_v63 }
 0x47b   :  { %v4294_v25 = vpop.f32.mrf.mxu0 }
 0x47d   :  { %v4295_v0 = vpop.f32.mrf.mxu0 }
 0x47e   :  { %v4296_v1 = vadd.f32 %v4295_v0, %v4294_v25 }
 0x47f   :  { %v4297_v2 = vpop.f32.mrf.mxu0 }
 0x480   :  { %v3409_v3 = vadd.f32 %v4296_v1, %v2904_v10 }
 0x481   :  { %v4298_v4 = vpop.f32.mrf.mxu0 }
 0x482   :  { %v3449_v5 = vadd.f32 %v3448_v51, %v3409_v3 }
 0x484   :  { %v3456_v6 = vmax.f32 %v3449_v5, 0.0 }
 0x486   :  { %v3459_v7 = vpack.c.bf16 %v3456_v6, %v3456_v6 }
 0x488   :  { %4423 = vmatmul.mubr.bf16.vlgmr.msra.gmra.mxu1 %v3459_v7 }
 0x525   :  { %v4325_v8 = vpop.f32.mrf.mxu0 }
 0x527   :  { %v4326_v9 = vpop.f32.mrf.mxu0 }
 0x528   :  { %v4327_v14 = vadd.f32 %v4326_v9, %v4325_v8 }
 0x529   :  { %v4328_v12 = vpop.f32.mrf.mxu0 }
 0x52a   :  { %v3694_v11 = vadd.f32 %v4327_v14, %v4123_v15 }
 0x52b   :  { %v4329_v13 = vpop.f32.mrf.mxu0 }
 0x548   :  { %v3733_v16 = vpop.f32.mrf.mxu1 }
 0x549   :  { %v3734_v17 = vadd.f32 %v3733_v16, %v3694_v11 }
 0x54a   :  { %v4424_v20 = vpop.f32.mrf.mxu1 }
 0x54b   :  { %3739 = vst [vmem:[#allocation13] sm:$0xff] %v3734_v17 }
 0x54c   :  { %v3736_v21 = vpop.f32.mrf.mxu1 }
 0x54d   :  { %5079 = shalt.err (!%p5076_p6)
}
 0x54e   :  { %3749 = dma.vmem_to_hbm [thread:$0]  %s3747_s13, 128, %s5333_s11, [#allocation4]   ;;  %v4425_v22 = vpop.f32.mrf.mxu1 }
 0x54f   :  { %5096 = dma.done.wait [#allocation4], 128  }
 0x550   :  { %5097 = vsyncadd [#allocation4], 4294967168 }
 0x551   :  { %3753 = vsyncpa [#allocation3], 1 }
 0x552   :  { %3754 = vsyncpa [#allocation6], 1 }
 0x553   :  { %3755 = vsyncpa [#allocation9], 1 }
 0x554   :  { %3756 = vsyncpa [#allocation12], 1 }
 0x555   :  { %3757 = vsyncpa [#allocation4], 1 }

</bundles_post_ra>
